<compile_context>
chip_gen: v6e
topology: v6e:2x2x1
jax: 0.10.0
libtpu: 0.0.40
codegen_flags: <defaults>
</compile_context>

<pallas_src>
import jax
import jax.numpy as jnp
from jax.experimental import pallas as pl
from jax.experimental.pallas import tpu as pltpu

HIDDEN = 32


def gru2_fc_kernel(x_ref,                      # (B, T, 1)   batch-first input, f32
                   wih0_ref, b0in_ref,         # (1, 3H) f32, (1, 3H) f32
                   whh0_ref, bhn0_ref,         # (H, 3H) bf16, (1, H) f32
                   wih1_ref, b1in_ref,         # (H, 3H) bf16, (1, 3H) f32
                   whh1_ref, bhn1_ref,         # (H, 3H) bf16, (1, H) f32
                   fcw_ref, fcb_ref,           # (1, H) f32, (1, 1) f32
                   out_ref):                   # (B, 1) f32
    B, T, _ = x_ref.shape
    H = whh0_ref.shape[0]

    # ---- Hoisted, non-recurrent work -------------------------------------
    # Layer-0 input projection for the whole sequence.  input_size == 1, so
    # W_ih0 @ x_t is a broadcast multiply; r/z biases already include b_hh.
    # ~T*B*3H floats (<2K elems) -> stays register/VMEM resident, no scratch.
    gi0_all = (x_ref[...] * wih0_ref[...][None]
               + b0in_ref[...][None])                         # (B, T, 3H) f32

    # Load fused weights / biases once (tiny, live across the unrolled loop).
    whh0 = whh0_ref[...]        # (H, 3H) bf16
    bhn0 = bhn0_ref[...]        # (1, H)  f32
    wih1 = wih1_ref[...]        # (H, 3H) bf16
    b1in = b1in_ref[...]        # (1, 3H) f32
    whh1 = whh1_ref[...]        # (H, 3H) bf16
    bhn1 = bhn1_ref[...]        # (1, H)  f32

    def sigmoid_t(v):
        # One EUP tanh push + two cheap VPU ops (vs exp + full-precision div).
        return 0.5 * jnp.tanh(0.5 * v) + 0.5

    h0 = jnp.zeros((B, H), jnp.float32)
    h1 = jnp.zeros((B, H), jnp.float32)

    # T is static and short: static Python unroll gives the scheduler full
    # cross-iteration visibility and lets gi0_all be indexed statically.
    for t in range(T):
        # ---- Layer 0 -------------------------------------------------------
        gi0 = gi0_all[:, t, :]                                       # (B, 3H)
        gh0 = jnp.dot(h0.astype(jnp.bfloat16), whh0,
                      preferred_element_type=jnp.float32)            # (B, 3H)
        rz0 = sigmoid_t(gi0[:, :2 * H] + gh0[:, :2 * H])   # fused r,z (1 EUP)
        r0, z0 = rz0[:, :H], rz0[:, H:]
        n0 = jnp.tanh(gi0[:, 2 * H:] + r0 * (gh0[:, 2 * H:] + bhn0))
        h0 = n0 + z0 * (h0 - n0)                 # == (1-z)*n + z*h

        # ---- Layer 1 (input = layer-0 hidden state) -------------------------
        gi1 = jnp.dot(h0.astype(jnp.bfloat16), wih1,
                      preferred_element_type=jnp.float32) + b1in
        gh1 = jnp.dot(h1.astype(jnp.bfloat16), whh1,
                      preferred_element_type=jnp.float32)
        rz1 = sigmoid_t(gi1[:, :2 * H] + gh1[:, :2 * H])
        r1, z1 = rz1[:, :H], rz1[:, H:]
        n1 = jnp.tanh(gi1[:, 2 * H:] + r1 * (gh1[:, 2 * H:] + bhn1))
        h1 = n1 + z1 * (h1 - n1)

    # fc(out[:, -1, :]) with out_features == 1: row reduce, not a 1-lane MXU
    # matmul.
    out_ref[...] = (jnp.sum(h1 * fcw_ref[...], axis=-1, keepdims=True)
                    + fcb_ref[...])


def pack_params(raw):
    """One-time (model-load) repack into fused, lane-dense arrays.

    Gate order [r, z, n].  r/z biases are pre-folded (b_ih + b_hh); b_hn is
    kept separate because it is scaled by r.  Recurrent / layer-1 input
    weights are cast to bf16 so each per-step matmul is a single MXU pass.
    """
    (wih0, whh0, bih0, bhh0, wih1, whh1, bih1, bhh1, fcw, fcb) = raw

    def cat(w):   # (3, in, H) -> (in, 3H)
        return jnp.concatenate([w[0], w[1], w[2]], axis=-1)

    wih0_row = cat(wih0)                                             # (1, 3H)
    b0_in = jnp.concatenate([bih0[0] + bhh0[0],
                             bih0[1] + bhh0[1],
                             bih0[2]], axis=-1)                      # (1, 3H)
    whh0_cat = cat(whh0).astype(jnp.bfloat16)                        # (H, 3H)
    bhn0 = bhh0[2]                                                   # (1, H)

    wih1_cat = cat(wih1).astype(jnp.bfloat16)                        # (H, 3H)
    b1_in = jnp.concatenate([bih1[0] + bhh1[0],
                             bih1[1] + bhh1[1],
                             bih1[2]], axis=-1)                      # (1, 3H)
    whh1_cat = cat(whh1).astype(jnp.bfloat16)                        # (H, 3H)
    bhn1 = bhh1[2]                                                   # (1, H)

    fcw_row = jnp.transpose(fcw)                                     # (1, H)
    return (wih0_row, b0_in, whh0_cat, bhn0,
            wih1_cat, b1_in, whh1_cat, bhn1,
            fcw_row, fcb)


@jax.jit
def net_forward(x, packed):
    """x: (B, T, 1) float32, batch-first like the PyTorch module.

    `packed` is the output of pack_params() (computed once at model load).
    """
    B, T, in_features = x.shape
    # The layer-0 broadcast-multiply input projection requires input_size == 1.
    assert in_features == 1, "kernel specialises nn.GRU(input_size=1)"

    vmem = pl.BlockSpec(memory_space=pltpu.MemorySpace.VMEM)
    return pl.pallas_call(
        gru2_fc_kernel,
        out_shape=jax.ShapeDtypeStruct((B, 1), jnp.float32),
        in_specs=[vmem] * (1 + len(packed)),
        out_specs=vmem,
    )(x.astype(jnp.float32), *packed)


def init_params(key, hidden=HIDDEN):
    """Deterministic init mirroring PyTorch's default U(-1/sqrt(H), 1/sqrt(H))."""
    k = 1.0 / float(jnp.sqrt(jnp.float32(hidden)))
    keys = jax.random.split(key, 10)

    def u(kk, shape):
        return jax.random.uniform(kk, shape, jnp.float32, -k, k)

    # GRU layer 0 (input_size = 1), gate order [r, z, n]
    wih0 = u(keys[0], (3, 1, hidden))
    whh0 = u(keys[1], (3, hidden, hidden))
    bih0 = u(keys[2], (3, 1, hidden))
    bhh0 = u(keys[3], (3, 1, hidden))
    # GRU layer 1 (input_size = hidden)
    wih1 = u(keys[4], (3, hidden, hidden))
    whh1 = u(keys[5], (3, hidden, hidden))
    bih1 = u(keys[6], (3, 1, hidden))
    bhh1 = u(keys[7], (3, 1, hidden))
    # Linear(32, 1): weight stored transposed (H, 1), bias (1, 1)
    fcw = u(keys[8], (hidden, 1))
    fcb = u(keys[9], (1, 1))
    return (wih0, whh0, bih0, bhh0, wih1, whh1, bih1, bhh1, fcw, fcb)


def ref_forward(x, params):
    """Pure-JAX f32 reference of the same GRU(2 layers)+Linear forward."""
    wih0, whh0, bih0, bhh0, wih1, whh1, bih1, bhh1, fcw, fcb = params
    B, T, _ = x.shape

    def cell(inp, h, wih, whh, bih, bhh):
        r = jax.nn.sigmoid(inp @ wih[0] + bih[0] + h @ whh[0] + bhh[0])
        z = jax.nn.sigmoid(inp @ wih[1] + bih[1] + h @ whh[1] + bhh[1])
        n = jnp.tanh(inp @ wih[2] + bih[2] + r * (h @ whh[2] + bhh[2]))
        return (1.0 - z) * n + z * h

    h0 = jnp.zeros((B, HIDDEN), jnp.float32)
    h1 = jnp.zeros((B, HIDDEN), jnp.float32)
    for t in range(T):
        h0 = cell(x[:, t, :], h0, wih0, whh0, bih0, bhh0)
        h1 = cell(h0, h1, wih1, whh1, bih1, bhh1)
    return h1 @ fcw + fcb


if __name__ == "__main__":
    key = jax.random.PRNGKey(0)
    k_params, k_x = jax.random.split(key)

    params = init_params(k_params)
    packed = pack_params(params)          # one-time repack at "model load"

    B, T = 2, 8                           # batch=2, seq=8, input_size=1
    x = jax.random.normal(k_x, (B, T, 1), jnp.float32)

    out = net_forward(x, packed)
    out = jax.block_until_ready(out)

    ref = ref_forward(x, params)
    assert out.shape == (B, 1)
    # Kernel uses bf16 MXU operands (single-pass matmuls, per perf review), so
    # compare against the f32 reference at a correspondingly looser tolerance.
    assert jnp.allclose(out, ref, atol=2e-2, rtol=2e-2), (out, ref)

    print("KERNEL_OK")
</pallas_src>

<mosaic_0001>
module attributes {stable_mosaic.version = 11 : i64} {
  func.func @gru2_fc_kernel(%arg0: memref<2x8x1xf32, #tpu.memory_space<vmem>>, %arg1: memref<1x96xf32, #tpu.memory_space<vmem>>, %arg2: memref<1x96xf32, #tpu.memory_space<vmem>>, %arg3: memref<32x96xbf16, #tpu.memory_space<vmem>>, %arg4: memref<1x32xf32, #tpu.memory_space<vmem>>, %arg5: memref<32x96xbf16, #tpu.memory_space<vmem>>, %arg6: memref<1x96xf32, #tpu.memory_space<vmem>>, %arg7: memref<32x96xbf16, #tpu.memory_space<vmem>>, %arg8: memref<1x32xf32, #tpu.memory_space<vmem>>, %arg9: memref<1x32xf32, #tpu.memory_space<vmem>>, %arg10: memref<1x1xf32, #tpu.memory_space<vmem>>, %arg11: memref<2x1xf32, #tpu.memory_space<vmem>>) attributes {dimension_semantics = [], scalar_prefetch = 0 : i64, scratch_operands = 0 : i64, tpu.core_type = #tpu.core_type<tc>} {
    %c0 = arith.constant 0 : index
    %c0_0 = arith.constant 0 : index
    %c0_1 = arith.constant 0 : index
    %0 = vector.load %arg0[%c0, %c0_0, %c0_1] : memref<2x8x1xf32, #tpu.memory_space<vmem>>, vector<2x8x1xf32>
    %c0_2 = arith.constant 0 : index
    %c0_3 = arith.constant 0 : index
    %1 = vector.load %arg1[%c0_2, %c0_3] : memref<1x96xf32, #tpu.memory_space<vmem>>, vector<1x96xf32>
    %2 = vector.shape_cast %1 : vector<1x96xf32> to vector<1x1x96xf32>
    %3 = vector.broadcast %0 : vector<2x8x1xf32> to vector<2x8x96xf32>
    %4 = vector.broadcast %2 : vector<1x1x96xf32> to vector<2x8x96xf32>
    %5 = arith.mulf %3, %4 : vector<2x8x96xf32>
    %c0_4 = arith.constant 0 : index
    %c0_5 = arith.constant 0 : index
    %6 = vector.load %arg2[%c0_4, %c0_5] : memref<1x96xf32, #tpu.memory_space<vmem>>, vector<1x96xf32>
    %7 = vector.shape_cast %6 : vector<1x96xf32> to vector<1x1x96xf32>
    %8 = vector.broadcast %7 : vector<1x1x96xf32> to vector<2x8x96xf32>
    %9 = arith.addf %5, %8 : vector<2x8x96xf32>
    %c0_6 = arith.constant 0 : index
    %c0_7 = arith.constant 0 : index
    %10 = vector.load %arg3[%c0_6, %c0_7] : memref<32x96xbf16, #tpu.memory_space<vmem>>, vector<32x96xbf16>
    %c0_8 = arith.constant 0 : index
    %c0_9 = arith.constant 0 : index
    %11 = vector.load %arg4[%c0_8, %c0_9] : memref<1x32xf32, #tpu.memory_space<vmem>>, vector<1x32xf32>
    %c0_10 = arith.constant 0 : index
    %c0_11 = arith.constant 0 : index
    %12 = vector.load %arg5[%c0_10, %c0_11] : memref<32x96xbf16, #tpu.memory_space<vmem>>, vector<32x96xbf16>
    %c0_12 = arith.constant 0 : index
    %c0_13 = arith.constant 0 : index
    %13 = vector.load %arg6[%c0_12, %c0_13] : memref<1x96xf32, #tpu.memory_space<vmem>>, vector<1x96xf32>
    %c0_14 = arith.constant 0 : index
    %c0_15 = arith.constant 0 : index
    %14 = vector.load %arg7[%c0_14, %c0_15] : memref<32x96xbf16, #tpu.memory_space<vmem>>, vector<32x96xbf16>
    %c0_16 = arith.constant 0 : index
    %c0_17 = arith.constant 0 : index
    %15 = vector.load %arg8[%c0_16, %c0_17] : memref<1x32xf32, #tpu.memory_space<vmem>>, vector<1x32xf32>
    %cst = arith.constant 0.000000e+00 : f32
    %16 = vector.broadcast %cst : f32 to vector<2x32xf32>
    %cst_18 = arith.constant 0.000000e+00 : f32
    %17 = vector.broadcast %cst_18 : f32 to vector<2x32xf32>
    %18 = vector.extract_strided_slice %9 {offsets = [0, 0, 0], sizes = [2, 1, 96], strides = [1, 1, 1]} : vector<2x8x96xf32> to vector<2x1x96xf32>
    %19 = vector.shape_cast %18 : vector<2x1x96xf32> to vector<2x96xf32>
    %20 = arith.truncf %16 : vector<2x32xf32> to vector<2x32xbf16>
    %cst_19 = arith.constant dense<0.000000e+00> : vector<2x96xf32>
    %21 = tpu.matmul %20, %10, %cst_19 {dimension_numbers = #tpu.dot_dimension_numbers<[1], [0], [0], [1], [0, 0, 1, 1], [], []>} : vector<2x32xbf16>, vector<32x96xbf16>, vector<2x96xf32> -> vector<2x96xf32>
    %22 = vector.extract_strided_slice %19 {offsets = [0, 0], sizes = [2, 64], strides = [1, 1]} : vector<2x96xf32> to vector<2x64xf32>
    %23 = vector.extract_strided_slice %21 {offsets = [0, 0], sizes = [2, 64], strides = [1, 1]} : vector<2x96xf32> to vector<2x64xf32>
    %24 = arith.addf %22, %23 : vector<2x64xf32>
    %cst_20 = arith.constant 5.000000e-01 : f32
    %25 = vector.broadcast %cst_20 : f32 to vector<2x64xf32>
    %26 = arith.mulf %25, %24 : vector<2x64xf32>
    %27 = math.tanh %26 : vector<2x64xf32>
    %cst_21 = arith.constant 5.000000e-01 : f32
    %28 = vector.broadcast %cst_21 : f32 to vector<2x64xf32>
    %29 = arith.mulf %28, %27 : vector<2x64xf32>
    %cst_22 = arith.constant 5.000000e-01 : f32
    %30 = vector.broadcast %cst_22 : f32 to vector<2x64xf32>
    %31 = arith.addf %29, %30 : vector<2x64xf32>
    %32 = vector.extract_strided_slice %31 {offsets = [0, 0], sizes = [2, 32], strides = [1, 1]} : vector<2x64xf32> to vector<2x32xf32>
    %33 = vector.extract_strided_slice %31 {offsets = [0, 32], sizes = [2, 32], strides = [1, 1]} : vector<2x64xf32> to vector<2x32xf32>
    %34 = vector.extract_strided_slice %19 {offsets = [0, 64], sizes = [2, 32], strides = [1, 1]} : vector<2x96xf32> to vector<2x32xf32>
    %35 = vector.extract_strided_slice %21 {offsets = [0, 64], sizes = [2, 32], strides = [1, 1]} : vector<2x96xf32> to vector<2x32xf32>
    %36 = vector.broadcast %11 : vector<1x32xf32> to vector<2x32xf32>
    %37 = arith.addf %35, %36 : vector<2x32xf32>
    %38 = arith.mulf %32, %37 : vector<2x32xf32>
    %39 = arith.addf %34, %38 : vector<2x32xf32>
    %40 = math.tanh %39 : vector<2x32xf32>
    %41 = arith.subf %16, %40 : vector<2x32xf32>
    %42 = arith.mulf %33, %41 : vector<2x32xf32>
    %43 = arith.addf %40, %42 : vector<2x32xf32>
    %44 = arith.truncf %43 : vector<2x32xf32> to vector<2x32xbf16>
    %cst_23 = arith.constant dense<0.000000e+00> : vector<2x96xf32>
    %45 = tpu.matmul %44, %12, %cst_23 {dimension_numbers = #tpu.dot_dimension_numbers<[1], [0], [0], [1], [0, 0, 1, 1], [], []>} : vector<2x32xbf16>, vector<32x96xbf16>, vector<2x96xf32> -> vector<2x96xf32>
    %46 = vector.broadcast %13 : vector<1x96xf32> to vector<2x96xf32>
    %47 = arith.addf %45, %46 : vector<2x96xf32>
    %48 = arith.truncf %17 : vector<2x32xf32> to vector<2x32xbf16>
    %cst_24 = arith.constant dense<0.000000e+00> : vector<2x96xf32>
    %49 = tpu.matmul %48, %14, %cst_24 {dimension_numbers = #tpu.dot_dimension_numbers<[1], [0], [0], [1], [0, 0, 1, 1], [], []>} : vector<2x32xbf16>, vector<32x96xbf16>, vector<2x96xf32> -> vector<2x96xf32>
    %50 = vector.extract_strided_slice %47 {offsets = [0, 0], sizes = [2, 64], strides = [1, 1]} : vector<2x96xf32> to vector<2x64xf32>
    %51 = vector.extract_strided_slice %49 {offsets = [0, 0], sizes = [2, 64], strides = [1, 1]} : vector<2x96xf32> to vector<2x64xf32>
    %52 = arith.addf %50, %51 : vector<2x64xf32>
    %cst_25 = arith.constant 5.000000e-01 : f32
    %53 = vector.broadcast %cst_25 : f32 to vector<2x64xf32>
    %54 = arith.mulf %53, %52 : vector<2x64xf32>
    %55 = math.tanh %54 : vector<2x64xf32>
    %cst_26 = arith.constant 5.000000e-01 : f32
    %56 = vector.broadcast %cst_26 : f32 to vector<2x64xf32>
    %57 = arith.mulf %56, %55 : vector<2x64xf32>
    %cst_27 = arith.constant 5.000000e-01 : f32
    %58 = vector.broadcast %cst_27 : f32 to vector<2x64xf32>
    %59 = arith.addf %57, %58 : vector<2x64xf32>
    %60 = vector.extract_strided_slice %59 {offsets = [0, 0], sizes = [2, 32], strides = [1, 1]} : vector<2x64xf32> to vector<2x32xf32>
    %61 = vector.extract_strided_slice %59 {offsets = [0, 32], sizes = [2, 32], strides = [1, 1]} : vector<2x64xf32> to vector<2x32xf32>
    %62 = vector.extract_strided_slice %47 {offsets = [0, 64], sizes = [2, 32], strides = [1, 1]} : vector<2x96xf32> to vector<2x32xf32>
    %63 = vector.extract_strided_slice %49 {offsets = [0, 64], sizes = [2, 32], strides = [1, 1]} : vector<2x96xf32> to vector<2x32xf32>
    %64 = vector.broadcast %15 : vector<1x32xf32> to vector<2x32xf32>
    %65 = arith.addf %63, %64 : vector<2x32xf32>
    %66 = arith.mulf %60, %65 : vector<2x32xf32>
    %67 = arith.addf %62, %66 : vector<2x32xf32>
    %68 = math.tanh %67 : vector<2x32xf32>
    %69 = arith.subf %17, %68 : vector<2x32xf32>
    %70 = arith.mulf %61, %69 : vector<2x32xf32>
    %71 = arith.addf %68, %70 : vector<2x32xf32>
    %72 = vector.extract_strided_slice %9 {offsets = [0, 1, 0], sizes = [2, 1, 96], strides = [1, 1, 1]} : vector<2x8x96xf32> to vector<2x1x96xf32>
    %73 = vector.shape_cast %72 : vector<2x1x96xf32> to vector<2x96xf32>
    %74 = arith.truncf %43 : vector<2x32xf32> to vector<2x32xbf16>
    %cst_28 = arith.constant dense<0.000000e+00> : vector<2x96xf32>
    %75 = tpu.matmul %74, %10, %cst_28 {dimension_numbers = #tpu.dot_dimension_numbers<[1], [0], [0], [1], [0, 0, 1, 1], [], []>} : vector<2x32xbf16>, vector<32x96xbf16>, vector<2x96xf32> -> vector<2x96xf32>
    %76 = vector.extract_strided_slice %73 {offsets = [0, 0], sizes = [2, 64], strides = [1, 1]} : vector<2x96xf32> to vector<2x64xf32>
    %77 = vector.extract_strided_slice %75 {offsets = [0, 0], sizes = [2, 64], strides = [1, 1]} : vector<2x96xf32> to vector<2x64xf32>
    %78 = arith.addf %76, %77 : vector<2x64xf32>
    %cst_29 = arith.constant 5.000000e-01 : f32
    %79 = vector.broadcast %cst_29 : f32 to vector<2x64xf32>
    %80 = arith.mulf %79, %78 : vector<2x64xf32>
    %81 = math.tanh %80 : vector<2x64xf32>
    %cst_30 = arith.constant 5.000000e-01 : f32
    %82 = vector.broadcast %cst_30 : f32 to vector<2x64xf32>
    %83 = arith.mulf %82, %81 : vector<2x64xf32>
    %cst_31 = arith.constant 5.000000e-01 : f32
    %84 = vector.broadcast %cst_31 : f32 to vector<2x64xf32>
    %85 = arith.addf %83, %84 : vector<2x64xf32>
    %86 = vector.extract_strided_slice %85 {offsets = [0, 0], sizes = [2, 32], strides = [1, 1]} : vector<2x64xf32> to vector<2x32xf32>
    %87 = vector.extract_strided_slice %85 {offsets = [0, 32], sizes = [2, 32], strides = [1, 1]} : vector<2x64xf32> to vector<2x32xf32>
    %88 = vector.extract_strided_slice %73 {offsets = [0, 64], sizes = [2, 32], strides = [1, 1]} : vector<2x96xf32> to vector<2x32xf32>
    %89 = vector.extract_strided_slice %75 {offsets = [0, 64], sizes = [2, 32], strides = [1, 1]} : vector<2x96xf32> to vector<2x32xf32>
    %90 = vector.broadcast %11 : vector<1x32xf32> to vector<2x32xf32>
    %91 = arith.addf %89, %90 : vector<2x32xf32>
    %92 = arith.mulf %86, %91 : vector<2x32xf32>
    %93 = arith.addf %88, %92 : vector<2x32xf32>
    %94 = math.tanh %93 : vector<2x32xf32>
    %95 = arith.subf %43, %94 : vector<2x32xf32>
    %96 = arith.mulf %87, %95 : vector<2x32xf32>
    %97 = arith.addf %94, %96 : vector<2x32xf32>
    %98 = arith.truncf %97 : vector<2x32xf32> to vector<2x32xbf16>
    %cst_32 = arith.constant dense<0.000000e+00> : vector<2x96xf32>
    %99 = tpu.matmul %98, %12, %cst_32 {dimension_numbers = #tpu.dot_dimension_numbers<[1], [0], [0], [1], [0, 0, 1, 1], [], []>} : vector<2x32xbf16>, vector<32x96xbf16>, vector<2x96xf32> -> vector<2x96xf32>
    %100 = vector.broadcast %13 : vector<1x96xf32> to vector<2x96xf32>
    %101 = arith.addf %99, %100 : vector<2x96xf32>
    %102 = arith.truncf %71 : vector<2x32xf32> to vector<2x32xbf16>
    %cst_33 = arith.constant dense<0.000000e+00> : vector<2x96xf32>
    %103 = tpu.matmul %102, %14, %cst_33 {dimension_numbers = #tpu.dot_dimension_numbers<[1], [0], [0], [1], [0, 0, 1, 1], [], []>} : vector<2x32xbf16>, vector<32x96xbf16>, vector<2x96xf32> -> vector<2x96xf32>
    %104 = vector.extract_strided_slice %101 {offsets = [0, 0], sizes = [2, 64], strides = [1, 1]} : vector<2x96xf32> to vector<2x64xf32>
    %105 = vector.extract_strided_slice %103 {offsets = [0, 0], sizes = [2, 64], strides = [1, 1]} : vector<2x96xf32> to vector<2x64xf32>
    %106 = arith.addf %104, %105 : vector<2x64xf32>
    %cst_34 = arith.constant 5.000000e-01 : f32
    %107 = vector.broadcast %cst_34 : f32 to vector<2x64xf32>
    %108 = arith.mulf %107, %106 : vector<2x64xf32>
    %109 = math.tanh %108 : vector<2x64xf32>
    %cst_35 = arith.constant 5.000000e-01 : f32
    %110 = vector.broadcast %cst_35 : f32 to vector<2x64xf32>
    %111 = arith.mulf %110, %109 : vector<2x64xf32>
    %cst_36 = arith.constant 5.000000e-01 : f32
    %112 = vector.broadcast %cst_36 : f32 to vector<2x64xf32>
    %113 = arith.addf %111, %112 : vector<2x64xf32>
    %114 = vector.extract_strided_slice %113 {offsets = [0, 0], sizes = [2, 32], strides = [1, 1]} : vector<2x64xf32> to vector<2x32xf32>
    %115 = vector.extract_strided_slice %113 {offsets = [0, 32], sizes = [2, 32], strides = [1, 1]} : vector<2x64xf32> to vector<2x32xf32>
    %116 = vector.extract_strided_slice %101 {offsets = [0, 64], sizes = [2, 32], strides = [1, 1]} : vector<2x96xf32> to vector<2x32xf32>
    %117 = vector.extract_strided_slice %103 {offsets = [0, 64], sizes = [2, 32], strides = [1, 1]} : vector<2x96xf32> to vector<2x32xf32>
    %118 = vector.broadcast %15 : vector<1x32xf32> to vector<2x32xf32>
    %119 = arith.addf %117, %118 : vector<2x32xf32>
    %120 = arith.mulf %114, %119 : vector<2x32xf32>
    %121 = arith.addf %116, %120 : vector<2x32xf32>
    %122 = math.tanh %121 : vector<2x32xf32>
    %123 = arith.subf %71, %122 : vector<2x32xf32>
    %124 = arith.mulf %115, %123 : vector<2x32xf32>
    %125 = arith.addf %122, %124 : vector<2x32xf32>
    %126 = vector.extract_strided_slice %9 {offsets = [0, 2, 0], sizes = [2, 1, 96], strides = [1, 1, 1]} : vector<2x8x96xf32> to vector<2x1x96xf32>
    %127 = vector.shape_cast %126 : vector<2x1x96xf32> to vector<2x96xf32>
    %128 = arith.truncf %97 : vector<2x32xf32> to vector<2x32xbf16>
    %cst_37 = arith.constant dense<0.000000e+00> : vector<2x96xf32>
    %129 = tpu.matmul %128, %10, %cst_37 {dimension_numbers = #tpu.dot_dimension_numbers<[1], [0], [0], [1], [0, 0, 1, 1], [], []>} : vector<2x32xbf16>, vector<32x96xbf16>, vector<2x96xf32> -> vector<2x96xf32>
    %130 = vector.extract_strided_slice %127 {offsets = [0, 0], sizes = [2, 64], strides = [1, 1]} : vector<2x96xf32> to vector<2x64xf32>
    %131 = vector.extract_strided_slice %129 {offsets = [0, 0], sizes = [2, 64], strides = [1, 1]} : vector<2x96xf32> to vector<2x64xf32>
    %132 = arith.addf %130, %131 : vector<2x64xf32>
    %cst_38 = arith.constant 5.000000e-01 : f32
    %133 = vector.broadcast %cst_38 : f32 to vector<2x64xf32>
    %134 = arith.mulf %133, %132 : vector<2x64xf32>
    %135 = math.tanh %134 : vector<2x64xf32>
    %cst_39 = arith.constant 5.000000e-01 : f32
    %136 = vector.broadcast %cst_39 : f32 to vector<2x64xf32>
    %137 = arith.mulf %136, %135 : vector<2x64xf32>
    %cst_40 = arith.constant 5.000000e-01 : f32
    %138 = vector.broadcast %cst_40 : f32 to vector<2x64xf32>
    %139 = arith.addf %137, %138 : vector<2x64xf32>
    %140 = vector.extract_strided_slice %139 {offsets = [0, 0], sizes = [2, 32], strides = [1, 1]} : vector<2x64xf32> to vector<2x32xf32>
    %141 = vector.extract_strided_slice %139 {offsets = [0, 32], sizes = [2, 32], strides = [1, 1]} : vector<2x64xf32> to vector<2x32xf32>
    %142 = vector.extract_strided_slice %127 {offsets = [0, 64], sizes = [2, 32], strides = [1, 1]} : vector<2x96xf32> to vector<2x32xf32>
    %143 = vector.extract_strided_slice %129 {offsets = [0, 64], sizes = [2, 32], strides = [1, 1]} : vector<2x96xf32> to vector<2x32xf32>
    %144 = vector.broadcast %11 : vector<1x32xf32> to vector<2x32xf32>
    %145 = arith.addf %143, %144 : vector<2x32xf32>
    %146 = arith.mulf %140, %145 : vector<2x32xf32>
    %147 = arith.addf %142, %146 : vector<2x32xf32>
    %148 = math.tanh %147 : vector<2x32xf32>
    %149 = arith.subf %97, %148 : vector<2x32xf32>
    %150 = arith.mulf %141, %149 : vector<2x32xf32>
    %151 = arith.addf %148, %150 : vector<2x32xf32>
    %152 = arith.truncf %151 : vector<2x32xf32> to vector<2x32xbf16>
    %cst_41 = arith.constant dense<0.000000e+00> : vector<2x96xf32>
    %153 = tpu.matmul %152, %12, %cst_41 {dimension_numbers = #tpu.dot_dimension_numbers<[1], [0], [0], [1], [0, 0, 1, 1], [], []>} : vector<2x32xbf16>, vector<32x96xbf16>, vector<2x96xf32> -> vector<2x96xf32>
    %154 = vector.broadcast %13 : vector<1x96xf32> to vector<2x96xf32>
    %155 = arith.addf %153, %154 : vector<2x96xf32>
    %156 = arith.truncf %125 : vector<2x32xf32> to vector<2x32xbf16>
    %cst_42 = arith.constant dense<0.000000e+00> : vector<2x96xf32>
    %157 = tpu.matmul %156, %14, %cst_42 {dimension_numbers = #tpu.dot_dimension_numbers<[1], [0], [0], [1], [0, 0, 1, 1], [], []>} : vector<2x32xbf16>, vector<32x96xbf16>, vector<2x96xf32> -> vector<2x96xf32>
    %158 = vector.extract_strided_slice %155 {offsets = [0, 0], sizes = [2, 64], strides = [1, 1]} : vector<2x96xf32> to vector<2x64xf32>
    %159 = vector.extract_strided_slice %157 {offsets = [0, 0], sizes = [2, 64], strides = [1, 1]} : vector<2x96xf32> to vector<2x64xf32>
    %160 = arith.addf %158, %159 : vector<2x64xf32>
    %cst_43 = arith.constant 5.000000e-01 : f32
    %161 = vector.broadcast %cst_43 : f32 to vector<2x64xf32>
    %162 = arith.mulf %161, %160 : vector<2x64xf32>
    %163 = math.tanh %162 : vector<2x64xf32>
    %cst_44 = arith.constant 5.000000e-01 : f32
    %164 = vector.broadcast %cst_44 : f32 to vector<2x64xf32>
    %165 = arith.mulf %164, %163 : vector<2x64xf32>
    %cst_45 = arith.constant 5.000000e-01 : f32
    %166 = vector.broadcast %cst_45 : f32 to vector<2x64xf32>
    %167 = arith.addf %165, %166 : vector<2x64xf32>
    %168 = vector.extract_strided_slice %167 {offsets = [0, 0], sizes = [2, 32], strides = [1, 1]} : vector<2x64xf32> to vector<2x32xf32>
    %169 = vector.extract_strided_slice %167 {offsets = [0, 32], sizes = [2, 32], strides = [1, 1]} : vector<2x64xf32> to vector<2x32xf32>
    %170 = vector.extract_strided_slice %155 {offsets = [0, 64], sizes = [2, 32], strides = [1, 1]} : vector<2x96xf32> to vector<2x32xf32>
    %171 = vector.extract_strided_slice %157 {offsets = [0, 64], sizes = [2, 32], strides = [1, 1]} : vector<2x96xf32> to vector<2x32xf32>
    %172 = vector.broadcast %15 : vector<1x32xf32> to vector<2x32xf32>
    %173 = arith.addf %171, %172 : vector<2x32xf32>
    %174 = arith.mulf %168, %173 : vector<2x32xf32>
    %175 = arith.addf %170, %174 : vector<2x32xf32>
    %176 = math.tanh %175 : vector<2x32xf32>
    %177 = arith.subf %125, %176 : vector<2x32xf32>
    %178 = arith.mulf %169, %177 : vector<2x32xf32>
    %179 = arith.addf %176, %178 : vector<2x32xf32>
    %180 = vector.extract_strided_slice %9 {offsets = [0, 3, 0], sizes = [2, 1, 96], strides = [1, 1, 1]} : vector<2x8x96xf32> to vector<2x1x96xf32>
    %181 = vector.shape_cast %180 : vector<2x1x96xf32> to vector<2x96xf32>
    %182 = arith.truncf %151 : vector<2x32xf32> to vector<2x32xbf16>
    %cst_46 = arith.constant dense<0.000000e+00> : vector<2x96xf32>
    %183 = tpu.matmul %182, %10, %cst_46 {dimension_numbers = #tpu.dot_dimension_numbers<[1], [0], [0], [1], [0, 0, 1, 1], [], []>} : vector<2x32xbf16>, vector<32x96xbf16>, vector<2x96xf32> -> vector<2x96xf32>
    %184 = vector.extract_strided_slice %181 {offsets = [0, 0], sizes = [2, 64], strides = [1, 1]} : vector<2x96xf32> to vector<2x64xf32>
    %185 = vector.extract_strided_slice %183 {offsets = [0, 0], sizes = [2, 64], strides = [1, 1]} : vector<2x96xf32> to vector<2x64xf32>
    %186 = arith.addf %184, %185 : vector<2x64xf32>
    %cst_47 = arith.constant 5.000000e-01 : f32
    %187 = vector.broadcast %cst_47 : f32 to vector<2x64xf32>
    %188 = arith.mulf %187, %186 : vector<2x64xf32>
    %189 = math.tanh %188 : vector<2x64xf32>
    %cst_48 = arith.constant 5.000000e-01 : f32
    %190 = vector.broadcast %cst_48 : f32 to vector<2x64xf32>
    %191 = arith.mulf %190, %189 : vector<2x64xf32>
    %cst_49 = arith.constant 5.000000e-01 : f32
    %192 = vector.broadcast %cst_49 : f32 to vector<2x64xf32>
    %193 = arith.addf %191, %192 : vector<2x64xf32>
    %194 = vector.extract_strided_slice %193 {offsets = [0, 0], sizes = [2, 32], strides = [1, 1]} : vector<2x64xf32> to vector<2x32xf32>
    %195 = vector.extract_strided_slice %193 {offsets = [0, 32], sizes = [2, 32], strides = [1, 1]} : vector<2x64xf32> to vector<2x32xf32>
    %196 = vector.extract_strided_slice %181 {offsets = [0, 64], sizes = [2, 32], strides = [1, 1]} : vector<2x96xf32> to vector<2x32xf32>
    %197 = vector.extract_strided_slice %183 {offsets = [0, 64], sizes = [2, 32], strides = [1, 1]} : vector<2x96xf32> to vector<2x32xf32>
    %198 = vector.broadcast %11 : vector<1x32xf32> to vector<2x32xf32>
    %199 = arith.addf %197, %198 : vector<2x32xf32>
    %200 = arith.mulf %194, %199 : vector<2x32xf32>
    %201 = arith.addf %196, %200 : vector<2x32xf32>
    %202 = math.tanh %201 : vector<2x32xf32>
    %203 = arith.subf %151, %202 : vector<2x32xf32>
    %204 = arith.mulf %195, %203 : vector<2x32xf32>
    %205 = arith.addf %202, %204 : vector<2x32xf32>
    %206 = arith.truncf %205 : vector<2x32xf32> to vector<2x32xbf16>
    %cst_50 = arith.constant dense<0.000000e+00> : vector<2x96xf32>
    %207 = tpu.matmul %206, %12, %cst_50 {dimension_numbers = #tpu.dot_dimension_numbers<[1], [0], [0], [1], [0, 0, 1, 1], [], []>} : vector<2x32xbf16>, vector<32x96xbf16>, vector<2x96xf32> -> vector<2x96xf32>
    %208 = vector.broadcast %13 : vector<1x96xf32> to vector<2x96xf32>
    %209 = arith.addf %207, %208 : vector<2x96xf32>
    %210 = arith.truncf %179 : vector<2x32xf32> to vector<2x32xbf16>
    %cst_51 = arith.constant dense<0.000000e+00> : vector<2x96xf32>
    %211 = tpu.matmul %210, %14, %cst_51 {dimension_numbers = #tpu.dot_dimension_numbers<[1], [0], [0], [1], [0, 0, 1, 1], [], []>} : vector<2x32xbf16>, vector<32x96xbf16>, vector<2x96xf32> -> vector<2x96xf32>
    %212 = vector.extract_strided_slice %209 {offsets = [0, 0], sizes = [2, 64], strides = [1, 1]} : vector<2x96xf32> to vector<2x64xf32>
    %213 = vector.extract_strided_slice %211 {offsets = [0, 0], sizes = [2, 64], strides = [1, 1]} : vector<2x96xf32> to vector<2x64xf32>
    %214 = arith.addf %212, %213 : vector<2x64xf32>
    %cst_52 = arith.constant 5.000000e-01 : f32
    %215 = vector.broadcast %cst_52 : f32 to vector<2x64xf32>
    %216 = arith.mulf %215, %214 : vector<2x64xf32>
    %217 = math.tanh %216 : vector<2x64xf32>
    %cst_53 = arith.constant 5.000000e-01 : f32
    %218 = vector.broadcast %cst_53 : f32 to vector<2x64xf32>
    %219 = arith.mulf %218, %217 : vector<2x64xf32>
    %cst_54 = arith.constant 5.000000e-01 : f32
    %220 = vector.broadcast %cst_54 : f32 to vector<2x64xf32>
    %221 = arith.addf %219, %220 : vector<2x64xf32>
    %222 = vector.extract_strided_slice %221 {offsets = [0, 0], sizes = [2, 32], strides = [1, 1]} : vector<2x64xf32> to vector<2x32xf32>
    %223 = vector.extract_strided_slice %221 {offsets = [0, 32], sizes = [2, 32], strides = [1, 1]} : vector<2x64xf32> to vector<2x32xf32>
    %224 = vector.extract_strided_slice %209 {offsets = [0, 64], sizes = [2, 32], strides = [1, 1]} : vector<2x96xf32> to vector<2x32xf32>
    %225 = vector.extract_strided_slice %211 {offsets = [0, 64], sizes = [2, 32], strides = [1, 1]} : vector<2x96xf32> to vector<2x32xf32>
    %226 = vector.broadcast %15 : vector<1x32xf32> to vector<2x32xf32>
    %227 = arith.addf %225, %226 : vector<2x32xf32>
    %228 = arith.mulf %222, %227 : vector<2x32xf32>
    %229 = arith.addf %224, %228 : vector<2x32xf32>
    %230 = math.tanh %229 : vector<2x32xf32>
    %231 = arith.subf %179, %230 : vector<2x32xf32>
    %232 = arith.mulf %223, %231 : vector<2x32xf32>
    %233 = arith.addf %230, %232 : vector<2x32xf32>
    %234 = vector.extract_strided_slice %9 {offsets = [0, 4, 0], sizes = [2, 1, 96], strides = [1, 1, 1]} : vector<2x8x96xf32> to vector<2x1x96xf32>
    %235 = vector.shape_cast %234 : vector<2x1x96xf32> to vector<2x96xf32>
    %236 = arith.truncf %205 : vector<2x32xf32> to vector<2x32xbf16>
    %cst_55 = arith.constant dense<0.000000e+00> : vector<2x96xf32>
    %237 = tpu.matmul %236, %10, %cst_55 {dimension_numbers = #tpu.dot_dimension_numbers<[1], [0], [0], [1], [0, 0, 1, 1], [], []>} : vector<2x32xbf16>, vector<32x96xbf16>, vector<2x96xf32> -> vector<2x96xf32>
    %238 = vector.extract_strided_slice %235 {offsets = [0, 0], sizes = [2, 64], strides = [1, 1]} : vector<2x96xf32> to vector<2x64xf32>
    %239 = vector.extract_strided_slice %237 {offsets = [0, 0], sizes = [2, 64], strides = [1, 1]} : vector<2x96xf32> to vector<2x64xf32>
    %240 = arith.addf %238, %239 : vector<2x64xf32>
    %cst_56 = arith.constant 5.000000e-01 : f32
    %241 = vector.broadcast %cst_56 : f32 to vector<2x64xf32>
    %242 = arith.mulf %241, %240 : vector<2x64xf32>
    %243 = math.tanh %242 : vector<2x64xf32>
    %cst_57 = arith.constant 5.000000e-01 : f32
    %244 = vector.broadcast %cst_57 : f32 to vector<2x64xf32>
    %245 = arith.mulf %244, %243 : vector<2x64xf32>
    %cst_58 = arith.constant 5.000000e-01 : f32
    %246 = vector.broadcast %cst_58 : f32 to vector<2x64xf32>
    %247 = arith.addf %245, %246 : vector<2x64xf32>
    %248 = vector.extract_strided_slice %247 {offsets = [0, 0], sizes = [2, 32], strides = [1, 1]} : vector<2x64xf32> to vector<2x32xf32>
    %249 = vector.extract_strided_slice %247 {offsets = [0, 32], sizes = [2, 32], strides = [1, 1]} : vector<2x64xf32> to vector<2x32xf32>
    %250 = vector.extract_strided_slice %235 {offsets = [0, 64], sizes = [2, 32], strides = [1, 1]} : vector<2x96xf32> to vector<2x32xf32>
    %251 = vector.extract_strided_slice %237 {offsets = [0, 64], sizes = [2, 32], strides = [1, 1]} : vector<2x96xf32> to vector<2x32xf32>
    %252 = vector.broadcast %11 : vector<1x32xf32> to vector<2x32xf32>
    %253 = arith.addf %251, %252 : vector<2x32xf32>
    %254 = arith.mulf %248, %253 : vector<2x32xf32>
    %255 = arith.addf %250, %254 : vector<2x32xf32>
    %256 = math.tanh %255 : vector<2x32xf32>
    %257 = arith.subf %205, %256 : vector<2x32xf32>
    %258 = arith.mulf %249, %257 : vector<2x32xf32>
    %259 = arith.addf %256, %258 : vector<2x32xf32>
    %260 = arith.truncf %259 : vector<2x32xf32> to vector<2x32xbf16>
    %cst_59 = arith.constant dense<0.000000e+00> : vector<2x96xf32>
    %261 = tpu.matmul %260, %12, %cst_59 {dimension_numbers = #tpu.dot_dimension_numbers<[1], [0], [0], [1], [0, 0, 1, 1], [], []>} : vector<2x32xbf16>, vector<32x96xbf16>, vector<2x96xf32> -> vector<2x96xf32>
    %262 = vector.broadcast %13 : vector<1x96xf32> to vector<2x96xf32>
    %263 = arith.addf %261, %262 : vector<2x96xf32>
    %264 = arith.truncf %233 : vector<2x32xf32> to vector<2x32xbf16>
    %cst_60 = arith.constant dense<0.000000e+00> : vector<2x96xf32>
    %265 = tpu.matmul %264, %14, %cst_60 {dimension_numbers = #tpu.dot_dimension_numbers<[1], [0], [0], [1], [0, 0, 1, 1], [], []>} : vector<2x32xbf16>, vector<32x96xbf16>, vector<2x96xf32> -> vector<2x96xf32>
    %266 = vector.extract_strided_slice %263 {offsets = [0, 0], sizes = [2, 64], strides = [1, 1]} : vector<2x96xf32> to vector<2x64xf32>
    %267 = vector.extract_strided_slice %265 {offsets = [0, 0], sizes = [2, 64], strides = [1, 1]} : vector<2x96xf32> to vector<2x64xf32>
    %268 = arith.addf %266, %267 : vector<2x64xf32>
    %cst_61 = arith.constant 5.000000e-01 : f32
    %269 = vector.broadcast %cst_61 : f32 to vector<2x64xf32>
    %270 = arith.mulf %269, %268 : vector<2x64xf32>
    %271 = math.tanh %270 : vector<2x64xf32>
    %cst_62 = arith.constant 5.000000e-01 : f32
    %272 = vector.broadcast %cst_62 : f32 to vector<2x64xf32>
    %273 = arith.mulf %272, %271 : vector<2x64xf32>
    %cst_63 = arith.constant 5.000000e-01 : f32
    %274 = vector.broadcast %cst_63 : f32 to vector<2x64xf32>
    %275 = arith.addf %273, %274 : vector<2x64xf32>
    %276 = vector.extract_strided_slice %275 {offsets = [0, 0], sizes = [2, 32], strides = [1, 1]} : vector<2x64xf32> to vector<2x32xf32>
    %277 = vector.extract_strided_slice %275 {offsets = [0, 32], sizes = [2, 32], strides = [1, 1]} : vector<2x64xf32> to vector<2x32xf32>
    %278 = vector.extract_strided_slice %263 {offsets = [0, 64], sizes = [2, 32], strides = [1, 1]} : vector<2x96xf32> to vector<2x32xf32>
    %279 = vector.extract_strided_slice %265 {offsets = [0, 64], sizes = [2, 32], strides = [1, 1]} : vector<2x96xf32> to vector<2x32xf32>
    %280 = vector.broadcast %15 : vector<1x32xf32> to vector<2x32xf32>
    %281 = arith.addf %279, %280 : vector<2x32xf32>
    %282 = arith.mulf %276, %281 : vector<2x32xf32>
    %283 = arith.addf %278, %282 : vector<2x32xf32>
    %284 = math.tanh %283 : vector<2x32xf32>
    %285 = arith.subf %233, %284 : vector<2x32xf32>
    %286 = arith.mulf %277, %285 : vector<2x32xf32>
    %287 = arith.addf %284, %286 : vector<2x32xf32>
    %288 = vector.extract_strided_slice %9 {offsets = [0, 5, 0], sizes = [2, 1, 96], strides = [1, 1, 1]} : vector<2x8x96xf32> to vector<2x1x96xf32>
    %289 = vector.shape_cast %288 : vector<2x1x96xf32> to vector<2x96xf32>
    %290 = arith.truncf %259 : vector<2x32xf32> to vector<2x32xbf16>
    %cst_64 = arith.constant dense<0.000000e+00> : vector<2x96xf32>
    %291 = tpu.matmul %290, %10, %cst_64 {dimension_numbers = #tpu.dot_dimension_numbers<[1], [0], [0], [1], [0, 0, 1, 1], [], []>} : vector<2x32xbf16>, vector<32x96xbf16>, vector<2x96xf32> -> vector<2x96xf32>
    %292 = vector.extract_strided_slice %289 {offsets = [0, 0], sizes = [2, 64], strides = [1, 1]} : vector<2x96xf32> to vector<2x64xf32>
    %293 = vector.extract_strided_slice %291 {offsets = [0, 0], sizes = [2, 64], strides = [1, 1]} : vector<2x96xf32> to vector<2x64xf32>
    %294 = arith.addf %292, %293 : vector<2x64xf32>
    %cst_65 = arith.constant 5.000000e-01 : f32
    %295 = vector.broadcast %cst_65 : f32 to vector<2x64xf32>
    %296 = arith.mulf %295, %294 : vector<2x64xf32>
    %297 = math.tanh %296 : vector<2x64xf32>
    %cst_66 = arith.constant 5.000000e-01 : f32
    %298 = vector.broadcast %cst_66 : f32 to vector<2x64xf32>
    %299 = arith.mulf %298, %297 : vector<2x64xf32>
    %cst_67 = arith.constant 5.000000e-01 : f32
    %300 = vector.broadcast %cst_67 : f32 to vector<2x64xf32>
    %301 = arith.addf %299, %300 : vector<2x64xf32>
    %302 = vector.extract_strided_slice %301 {offsets = [0, 0], sizes = [2, 32], strides = [1, 1]} : vector<2x64xf32> to vector<2x32xf32>
    %303 = vector.extract_strided_slice %301 {offsets = [0, 32], sizes = [2, 32], strides = [1, 1]} : vector<2x64xf32> to vector<2x32xf32>
    %304 = vector.extract_strided_slice %289 {offsets = [0, 64], sizes = [2, 32], strides = [1, 1]} : vector<2x96xf32> to vector<2x32xf32>
    %305 = vector.extract_strided_slice %291 {offsets = [0, 64], sizes = [2, 32], strides = [1, 1]} : vector<2x96xf32> to vector<2x32xf32>
    %306 = vector.broadcast %11 : vector<1x32xf32> to vector<2x32xf32>
    %307 = arith.addf %305, %306 : vector<2x32xf32>
    %308 = arith.mulf %302, %307 : vector<2x32xf32>
    %309 = arith.addf %304, %308 : vector<2x32xf32>
    %310 = math.tanh %309 : vector<2x32xf32>
    %311 = arith.subf %259, %310 : vector<2x32xf32>
    %312 = arith.mulf %303, %311 : vector<2x32xf32>
    %313 = arith.addf %310, %312 : vector<2x32xf32>
    %314 = arith.truncf %313 : vector<2x32xf32> to vector<2x32xbf16>
    %cst_68 = arith.constant dense<0.000000e+00> : vector<2x96xf32>
    %315 = tpu.matmul %314, %12, %cst_68 {dimension_numbers = #tpu.dot_dimension_numbers<[1], [0], [0], [1], [0, 0, 1, 1], [], []>} : vector<2x32xbf16>, vector<32x96xbf16>, vector<2x96xf32> -> vector<2x96xf32>
    %316 = vector.broadcast %13 : vector<1x96xf32> to vector<2x96xf32>
    %317 = arith.addf %315, %316 : vector<2x96xf32>
    %318 = arith.truncf %287 : vector<2x32xf32> to vector<2x32xbf16>
    %cst_69 = arith.constant dense<0.000000e+00> : vector<2x96xf32>
    %319 = tpu.matmul %318, %14, %cst_69 {dimension_numbers = #tpu.dot_dimension_numbers<[1], [0], [0], [1], [0, 0, 1, 1], [], []>} : vector<2x32xbf16>, vector<32x96xbf16>, vector<2x96xf32> -> vector<2x96xf32>
    %320 = vector.extract_strided_slice %317 {offsets = [0, 0], sizes = [2, 64], strides = [1, 1]} : vector<2x96xf32> to vector<2x64xf32>
    %321 = vector.extract_strided_slice %319 {offsets = [0, 0], sizes = [2, 64], strides = [1, 1]} : vector<2x96xf32> to vector<2x64xf32>
    %322 = arith.addf %320, %321 : vector<2x64xf32>
    %cst_70 = arith.constant 5.000000e-01 : f32
    %323 = vector.broadcast %cst_70 : f32 to vector<2x64xf32>
    %324 = arith.mulf %323, %322 : vector<2x64xf32>
    %325 = math.tanh %324 : vector<2x64xf32>
    %cst_71 = arith.constant 5.000000e-01 : f32
    %326 = vector.broadcast %cst_71 : f32 to vector<2x64xf32>
    %327 = arith.mulf %326, %325 : vector<2x64xf32>
    %cst_72 = arith.constant 5.000000e-01 : f32
    %328 = vector.broadcast %cst_72 : f32 to vector<2x64xf32>
    %329 = arith.addf %327, %328 : vector<2x64xf32>
    %330 = vector.extract_strided_slice %329 {offsets = [0, 0], sizes = [2, 32], strides = [1, 1]} : vector<2x64xf32> to vector<2x32xf32>
    %331 = vector.extract_strided_slice %329 {offsets = [0, 32], sizes = [2, 32], strides = [1, 1]} : vector<2x64xf32> to vector<2x32xf32>
    %332 = vector.extract_strided_slice %317 {offsets = [0, 64], sizes = [2, 32], strides = [1, 1]} : vector<2x96xf32> to vector<2x32xf32>
    %333 = vector.extract_strided_slice %319 {offsets = [0, 64], sizes = [2, 32], strides = [1, 1]} : vector<2x96xf32> to vector<2x32xf32>
    %334 = vector.broadcast %15 : vector<1x32xf32> to vector<2x32xf32>
    %335 = arith.addf %333, %334 : vector<2x32xf32>
    %336 = arith.mulf %330, %335 : vector<2x32xf32>
    %337 = arith.addf %332, %336 : vector<2x32xf32>
    %338 = math.tanh %337 : vector<2x32xf32>
    %339 = arith.subf %287, %338 : vector<2x32xf32>
    %340 = arith.mulf %331, %339 : vector<2x32xf32>
    %341 = arith.addf %338, %340 : vector<2x32xf32>
    %342 = vector.extract_strided_slice %9 {offsets = [0, 6, 0], sizes = [2, 1, 96], strides = [1, 1, 1]} : vector<2x8x96xf32> to vector<2x1x96xf32>
    %343 = vector.shape_cast %342 : vector<2x1x96xf32> to vector<2x96xf32>
    %344 = arith.truncf %313 : vector<2x32xf32> to vector<2x32xbf16>
    %cst_73 = arith.constant dense<0.000000e+00> : vector<2x96xf32>
    %345 = tpu.matmul %344, %10, %cst_73 {dimension_numbers = #tpu.dot_dimension_numbers<[1], [0], [0], [1], [0, 0, 1, 1], [], []>} : vector<2x32xbf16>, vector<32x96xbf16>, vector<2x96xf32> -> vector<2x96xf32>
    %346 = vector.extract_strided_slice %343 {offsets = [0, 0], sizes = [2, 64], strides = [1, 1]} : vector<2x96xf32> to vector<2x64xf32>
    %347 = vector.extract_strided_slice %345 {offsets = [0, 0], sizes = [2, 64], strides = [1, 1]} : vector<2x96xf32> to vector<2x64xf32>
    %348 = arith.addf %346, %347 : vector<2x64xf32>
    %cst_74 = arith.constant 5.000000e-01 : f32
    %349 = vector.broadcast %cst_74 : f32 to vector<2x64xf32>
    %350 = arith.mulf %349, %348 : vector<2x64xf32>
    %351 = math.tanh %350 : vector<2x64xf32>
    %cst_75 = arith.constant 5.000000e-01 : f32
    %352 = vector.broadcast %cst_75 : f32 to vector<2x64xf32>
    %353 = arith.mulf %352, %351 : vector<2x64xf32>
    %cst_76 = arith.constant 5.000000e-01 : f32
    %354 = vector.broadcast %cst_76 : f32 to vector<2x64xf32>
    %355 = arith.addf %353, %354 : vector<2x64xf32>
    %356 = vector.extract_strided_slice %355 {offsets = [0, 0], sizes = [2, 32], strides = [1, 1]} : vector<2x64xf32> to vector<2x32xf32>
    %357 = vector.extract_strided_slice %355 {offsets = [0, 32], sizes = [2, 32], strides = [1, 1]} : vector<2x64xf32> to vector<2x32xf32>
    %358 = vector.extract_strided_slice %343 {offsets = [0, 64], sizes = [2, 32], strides = [1, 1]} : vector<2x96xf32> to vector<2x32xf32>
    %359 = vector.extract_strided_slice %345 {offsets = [0, 64], sizes = [2, 32], strides = [1, 1]} : vector<2x96xf32> to vector<2x32xf32>
    %360 = vector.broadcast %11 : vector<1x32xf32> to vector<2x32xf32>
    %361 = arith.addf %359, %360 : vector<2x32xf32>
    %362 = arith.mulf %356, %361 : vector<2x32xf32>
    %363 = arith.addf %358, %362 : vector<2x32xf32>
    %364 = math.tanh %363 : vector<2x32xf32>
    %365 = arith.subf %313, %364 : vector<2x32xf32>
    %366 = arith.mulf %357, %365 : vector<2x32xf32>
    %367 = arith.addf %364, %366 : vector<2x32xf32>
    %368 = arith.truncf %367 : vector<2x32xf32> to vector<2x32xbf16>
    %cst_77 = arith.constant dense<0.000000e+00> : vector<2x96xf32>
    %369 = tpu.matmul %368, %12, %cst_77 {dimension_numbers = #tpu.dot_dimension_numbers<[1], [0], [0], [1], [0, 0, 1, 1], [], []>} : vector<2x32xbf16>, vector<32x96xbf16>, vector<2x96xf32> -> vector<2x96xf32>
    %370 = vector.broadcast %13 : vector<1x96xf32> to vector<2x96xf32>
    %371 = arith.addf %369, %370 : vector<2x96xf32>
    %372 = arith.truncf %341 : vector<2x32xf32> to vector<2x32xbf16>
    %cst_78 = arith.constant dense<0.000000e+00> : vector<2x96xf32>
    %373 = tpu.matmul %372, %14, %cst_78 {dimension_numbers = #tpu.dot_dimension_numbers<[1], [0], [0], [1], [0, 0, 1, 1], [], []>} : vector<2x32xbf16>, vector<32x96xbf16>, vector<2x96xf32> -> vector<2x96xf32>
    %374 = vector.extract_strided_slice %371 {offsets = [0, 0], sizes = [2, 64], strides = [1, 1]} : vector<2x96xf32> to vector<2x64xf32>
    %375 = vector.extract_strided_slice %373 {offsets = [0, 0], sizes = [2, 64], strides = [1, 1]} : vector<2x96xf32> to vector<2x64xf32>
    %376 = arith.addf %374, %375 : vector<2x64xf32>
    %cst_79 = arith.constant 5.000000e-01 : f32
    %377 = vector.broadcast %cst_79 : f32 to vector<2x64xf32>
    %378 = arith.mulf %377, %376 : vector<2x64xf32>
    %379 = math.tanh %378 : vector<2x64xf32>
    %cst_80 = arith.constant 5.000000e-01 : f32
    %380 = vector.broadcast %cst_80 : f32 to vector<2x64xf32>
    %381 = arith.mulf %380, %379 : vector<2x64xf32>
    %cst_81 = arith.constant 5.000000e-01 : f32
    %382 = vector.broadcast %cst_81 : f32 to vector<2x64xf32>
    %383 = arith.addf %381, %382 : vector<2x64xf32>
    %384 = vector.extract_strided_slice %383 {offsets = [0, 0], sizes = [2, 32], strides = [1, 1]} : vector<2x64xf32> to vector<2x32xf32>
    %385 = vector.extract_strided_slice %383 {offsets = [0, 32], sizes = [2, 32], strides = [1, 1]} : vector<2x64xf32> to vector<2x32xf32>
    %386 = vector.extract_strided_slice %371 {offsets = [0, 64], sizes = [2, 32], strides = [1, 1]} : vector<2x96xf32> to vector<2x32xf32>
    %387 = vector.extract_strided_slice %373 {offsets = [0, 64], sizes = [2, 32], strides = [1, 1]} : vector<2x96xf32> to vector<2x32xf32>
    %388 = vector.broadcast %15 : vector<1x32xf32> to vector<2x32xf32>
    %389 = arith.addf %387, %388 : vector<2x32xf32>
    %390 = arith.mulf %384, %389 : vector<2x32xf32>
    %391 = arith.addf %386, %390 : vector<2x32xf32>
    %392 = math.tanh %391 : vector<2x32xf32>
    %393 = arith.subf %341, %392 : vector<2x32xf32>
    %394 = arith.mulf %385, %393 : vector<2x32xf32>
    %395 = arith.addf %392, %394 : vector<2x32xf32>
    %396 = vector.extract_strided_slice %9 {offsets = [0, 7, 0], sizes = [2, 1, 96], strides = [1, 1, 1]} : vector<2x8x96xf32> to vector<2x1x96xf32>
    %397 = vector.shape_cast %396 : vector<2x1x96xf32> to vector<2x96xf32>
    %398 = arith.truncf %367 : vector<2x32xf32> to vector<2x32xbf16>
    %cst_82 = arith.constant dense<0.000000e+00> : vector<2x96xf32>
    %399 = tpu.matmul %398, %10, %cst_82 {dimension_numbers = #tpu.dot_dimension_numbers<[1], [0], [0], [1], [0, 0, 1, 1], [], []>} : vector<2x32xbf16>, vector<32x96xbf16>, vector<2x96xf32> -> vector<2x96xf32>
    %400 = vector.extract_strided_slice %397 {offsets = [0, 0], sizes = [2, 64], strides = [1, 1]} : vector<2x96xf32> to vector<2x64xf32>
    %401 = vector.extract_strided_slice %399 {offsets = [0, 0], sizes = [2, 64], strides = [1, 1]} : vector<2x96xf32> to vector<2x64xf32>
    %402 = arith.addf %400, %401 : vector<2x64xf32>
    %cst_83 = arith.constant 5.000000e-01 : f32
    %403 = vector.broadcast %cst_83 : f32 to vector<2x64xf32>
    %404 = arith.mulf %403, %402 : vector<2x64xf32>
    %405 = math.tanh %404 : vector<2x64xf32>
    %cst_84 = arith.constant 5.000000e-01 : f32
    %406 = vector.broadcast %cst_84 : f32 to vector<2x64xf32>
    %407 = arith.mulf %406, %405 : vector<2x64xf32>
    %cst_85 = arith.constant 5.000000e-01 : f32
    %408 = vector.broadcast %cst_85 : f32 to vector<2x64xf32>
    %409 = arith.addf %407, %408 : vector<2x64xf32>
    %410 = vector.extract_strided_slice %409 {offsets = [0, 0], sizes = [2, 32], strides = [1, 1]} : vector<2x64xf32> to vector<2x32xf32>
    %411 = vector.extract_strided_slice %409 {offsets = [0, 32], sizes = [2, 32], strides = [1, 1]} : vector<2x64xf32> to vector<2x32xf32>
    %412 = vector.extract_strided_slice %397 {offsets = [0, 64], sizes = [2, 32], strides = [1, 1]} : vector<2x96xf32> to vector<2x32xf32>
    %413 = vector.extract_strided_slice %399 {offsets = [0, 64], sizes = [2, 32], strides = [1, 1]} : vector<2x96xf32> to vector<2x32xf32>
    %414 = vector.broadcast %11 : vector<1x32xf32> to vector<2x32xf32>
    %415 = arith.addf %413, %414 : vector<2x32xf32>
    %416 = arith.mulf %410, %415 : vector<2x32xf32>
    %417 = arith.addf %412, %416 : vector<2x32xf32>
    %418 = math.tanh %417 : vector<2x32xf32>
    %419 = arith.subf %367, %418 : vector<2x32xf32>
    %420 = arith.mulf %411, %419 : vector<2x32xf32>
    %421 = arith.addf %418, %420 : vector<2x32xf32>
    %422 = arith.truncf %421 : vector<2x32xf32> to vector<2x32xbf16>
    %cst_86 = arith.constant dense<0.000000e+00> : vector<2x96xf32>
    %423 = tpu.matmul %422, %12, %cst_86 {dimension_numbers = #tpu.dot_dimension_numbers<[1], [0], [0], [1], [0, 0, 1, 1], [], []>} : vector<2x32xbf16>, vector<32x96xbf16>, vector<2x96xf32> -> vector<2x96xf32>
    %424 = vector.broadcast %13 : vector<1x96xf32> to vector<2x96xf32>
    %425 = arith.addf %423, %424 : vector<2x96xf32>
    %426 = arith.truncf %395 : vector<2x32xf32> to vector<2x32xbf16>
    %cst_87 = arith.constant dense<0.000000e+00> : vector<2x96xf32>
    %427 = tpu.matmul %426, %14, %cst_87 {dimension_numbers = #tpu.dot_dimension_numbers<[1], [0], [0], [1], [0, 0, 1, 1], [], []>} : vector<2x32xbf16>, vector<32x96xbf16>, vector<2x96xf32> -> vector<2x96xf32>
    %428 = vector.extract_strided_slice %425 {offsets = [0, 0], sizes = [2, 64], strides = [1, 1]} : vector<2x96xf32> to vector<2x64xf32>
    %429 = vector.extract_strided_slice %427 {offsets = [0, 0], sizes = [2, 64], strides = [1, 1]} : vector<2x96xf32> to vector<2x64xf32>
    %430 = arith.addf %428, %429 : vector<2x64xf32>
    %cst_88 = arith.constant 5.000000e-01 : f32
    %431 = vector.broadcast %cst_88 : f32 to vector<2x64xf32>
    %432 = arith.mulf %431, %430 : vector<2x64xf32>
    %433 = math.tanh %432 : vector<2x64xf32>
    %cst_89 = arith.constant 5.000000e-01 : f32
    %434 = vector.broadcast %cst_89 : f32 to vector<2x64xf32>
    %435 = arith.mulf %434, %433 : vector<2x64xf32>
    %cst_90 = arith.constant 5.000000e-01 : f32
    %436 = vector.broadcast %cst_90 : f32 to vector<2x64xf32>
    %437 = arith.addf %435, %436 : vector<2x64xf32>
    %438 = vector.extract_strided_slice %437 {offsets = [0, 0], sizes = [2, 32], strides = [1, 1]} : vector<2x64xf32> to vector<2x32xf32>
    %439 = vector.extract_strided_slice %437 {offsets = [0, 32], sizes = [2, 32], strides = [1, 1]} : vector<2x64xf32> to vector<2x32xf32>
    %440 = vector.extract_strided_slice %425 {offsets = [0, 64], sizes = [2, 32], strides = [1, 1]} : vector<2x96xf32> to vector<2x32xf32>
    %441 = vector.extract_strided_slice %427 {offsets = [0, 64], sizes = [2, 32], strides = [1, 1]} : vector<2x96xf32> to vector<2x32xf32>
    %442 = vector.broadcast %15 : vector<1x32xf32> to vector<2x32xf32>
    %443 = arith.addf %441, %442 : vector<2x32xf32>
    %444 = arith.mulf %438, %443 : vector<2x32xf32>
    %445 = arith.addf %440, %444 : vector<2x32xf32>
    %446 = math.tanh %445 : vector<2x32xf32>
    %447 = arith.subf %395, %446 : vector<2x32xf32>
    %448 = arith.mulf %439, %447 : vector<2x32xf32>
    %449 = arith.addf %446, %448 : vector<2x32xf32>
    %c0_91 = arith.constant 0 : index
    %c0_92 = arith.constant 0 : index
    %450 = vector.load %arg9[%c0_91, %c0_92] : memref<1x32xf32, #tpu.memory_space<vmem>>, vector<1x32xf32>
    %451 = vector.broadcast %450 : vector<1x32xf32> to vector<2x32xf32>
    %452 = arith.mulf %449, %451 : vector<2x32xf32>
    %cst_93 = arith.constant dense<0.000000e+00> : vector<2xf32>
    %453 = vector.multi_reduction <add>, %452, %cst_93 [1] : vector<2x32xf32> to vector<2xf32>
    %454 = vector.shape_cast %453 : vector<2xf32> to vector<2x1xf32>
    %c0_94 = arith.constant 0 : index
    %c0_95 = arith.constant 0 : index
    %455 = vector.load %arg10[%c0_94, %c0_95] : memref<1x1xf32, #tpu.memory_space<vmem>>, vector<1x1xf32>
    %456 = vector.broadcast %455 : vector<1x1xf32> to vector<2x1xf32>
    %457 = arith.addf %454, %456 : vector<2x1xf32>
    %c0_96 = arith.constant 0 : index
    %c0_97 = arith.constant 0 : index
    %458 = vector.load %arg11[%c0_96, %c0_97] : memref<2x1xf32, #tpu.memory_space<vmem>>, vector<2x1xf32>
    tpu.vector_store %arg11[%c0_96, %c0_97], %457 {strides = array<i32>} : memref<2x1xf32, #tpu.memory_space<vmem>>, vector<2x1xf32>,
    return
  }
}

</mosaic_0001>

<bundles_post_ra>
// kernel: net_forward.1
= control target key start
LH: loop header
LB: loop body
LE: loop exit
PB: predicated region body
PF: predicated region fallthrough
CT: control target
= control target key end

     0   :  { %s3279_s0 = inlined_call_operand.vmem [shape: f32[2,8,1], index: 0, kind: input, shape index: {}]   ;;  %s3280_s1 = inlined_call_operand.hbm [shape: f32[1,96], index: 1, kind: input, shape index: {}]   ;;  %s3281_s2 = inlined_call_operand.hbm [shape: f32[1,96], index: 2, kind: input, shape index: {}]   ;;  %s3282_s3 = inlined_call_operand.vmem [shape: bf16[32,96], index: 3, kind: input, shape index: {}]   ;;  %s3283_s4 = inlined_call_operand.hbm [shape: f32[1,32], index: 4, kind: input, shape index: {}]   ;;  %s3284_s5 = inlined_call_operand.hbm [shape: bf16[32,96], index: 5, kind: input, shape index: {}]   ;;  %s3285_s6 = inlined_call_operand.hbm [shape: f32[1,96], index: 6, kind: input, shape index: {}]   ;;  %s3286_s7 = inlined_call_operand.vmem [shape: bf16[32,96], index: 7, kind: input, shape index: {}]   ;;  %s3287_s8 = inlined_call_operand.vmem [shape: f32[1,32], index: 8, kind: input, shape index: {}]   ;;  %s3288_s9 = inlined_call_operand.vmem [shape: f32[1,32], index: 9, kind: input, shape index: {}]   ;;  %s3289_s10 = inlined_call_operand.<no memory space> [shape: f32[1,1], index: 10, kind: input, shape index: {}]   ;;  %s3290_s11 = inlined_call_operand.vmem [shape: f32[2,1], index: 11, kind: output, shape index: {}]  }
   0x1   :  { %v16_v0 = vstv %s3289_s10 }
   0x2   :  { %17 = vst [vmem:[#allocation2] sm:$0x1] %v16_v0 }
   0x3   :  { %18 = vsyncpa [#allocation4], 0 }
   0x4   :  { %19 = vsyncpa [#allocation6], 0 }
   0x5   :  { %20 = vsyncpa [#allocation9], 0  ;;  %s2663_s19 = smov [#allocation5]   ;;  %s2664_s21 = smov [#allocation8]  }
   0x6   :  { %s39_s20 = sshll.u32 %s2663_s19, 4  ;;  %s60_s22 = sshll.u32 %s2664_s21, 4  ;;  %s40_s20 = int_to_ptr.vmem [resolvable:$true] %s39_s20  ;;  %s61_s22 = int_to_ptr.vmem [resolvable:$true] %s60_s22 }
   0x7   :  { %s2565_s23 = scalar_lea.vmem %s40_s20, 16  ;;  %s2569_s24 = scalar_lea.vmem %s40_s20, 32 }
   0x8   :  { %p2566_p0 = scmp.ne.s32.totalorder %s40_s20, %s2565_s23  ;;  %p2570_p1 = scmp.lt.s32.totalorder %s40_s20, %s40_s20 }
   0x9   :  { %p2571_p2 = scmp.lt.s32.totalorder %s2569_s24, %s2565_s23 }
   0xb   :  { %p2572_p3 = por %p2571_p2, %p2570_p1 }
   0xd   :  { %p2573_p4 = pnand %p2572_p3, %p2566_p0 }
   0xf   :  { %2576 = shalt.err (!%p2573_p4)
}
  0x10   :  { %42 = dma.hbm_to_vmem [thread:$0]  %s3281_s2, 16, %s40_s20, [#allocation6]  }
  0x11   :  { %s2585_s26 = scalar_lea.vmem %s61_s22, 256  ;;  %p2590_p6 = scmp.lt.s32.totalorder %s61_s22, %s61_s22 }
  0x12   :  { %p2586_p5 = scmp.ne.s32.totalorder %s61_s22, %s2585_s26  ;;  %p2591_p7 = scmp.lt.s32.totalorder %s2585_s26, %s2585_s26 }
  0x14   :  { %p2592_p8 = por %p2591_p7, %p2590_p6 }
  0x16   :  { %p2593_p9 = pnand %p2592_p8, %p2586_p5 }
  0x18   :  { %2596 = shalt.err (!%p2593_p9)
}
  0x19   :  { %s2665_s27 = smov 64   ;;  %s2666_s28 = smov 4  }
  0x1a   :  { %66 = dma.hbm_to_vmem [thread:$0]  %s3284_s5, 256, %s61_s22, [#allocation9], %s2665_s27, %s2665_s27, %s2666_s28  }
  0x1b   :  { %s2667_s12 = smov [#allocation3]   ;;  %s2668_s14 = smov [#allocation7]  }
  0x1c   :  { %s29_s13 = sshll.u32 %s2667_s12, 4  ;;  %s51_s15 = sshll.u32 %s2668_s14, 4  ;;  %s30_s13 = int_to_ptr.vmem [resolvable:$true] %s29_s13  ;;  %s52_s15 = int_to_ptr.vmem [resolvable:$true] %s51_s15 }
  0x1d   :  { %s2605_s2 = scalar_lea.vmem %s30_s13, 16  ;;  %s2609_s16 = scalar_lea.vmem %s30_s13, 32 }
  0x1e   :  { %p2606_p10 = scmp.ne.s32.totalorder %s30_s13, %s2605_s2  ;;  %p2610_p11 = scmp.lt.s32.totalorder %s30_s13, %s30_s13 }
  0x1f   :  { %p2611_p12 = scmp.lt.s32.totalorder %s2609_s16, %s2605_s2 }
  0x21   :  { %p2612_p13 = por %p2611_p12, %p2610_p11 }
  0x23   :  { %p2613_p0 = pnand %p2612_p13, %p2606_p10 }
  0x25   :  { %2616 = shalt.err (!%p2613_p0)
}
  0x26   :  { %32 = dma.hbm_to_vmem [thread:$0]  %s3280_s1, 16, %s30_s13, [#allocation4]  }
  0x27   :  { %s2625_s19 = scalar_lea.vmem %s52_s15, 16  ;;  %s2629_s5 = scalar_lea.vmem %s52_s15, 32 }
  0x28   :  { %p2626_p1 = scmp.ne.s32.totalorder %s52_s15, %s2625_s19  ;;  %p2630_p2 = scmp.lt.s32.totalorder %s52_s15, %s52_s15 }
  0x29   :  { %p2631_p3 = scmp.lt.s32.totalorder %s2629_s5, %s2625_s19 }
  0x2b   :  { %p2632_p4 = por %p2631_p3, %p2630_p2 }
  0x2d   :  { %p2633_p5 = pnand %p2632_p4, %p2626_p1 }
  0x2f   :  { %2636 = shalt.err (!%p2633_p5)
}
  0x30   :  { %54 = dma.hbm_to_vmem [thread:$0]  %s3283_s4, 16, %s52_s15, [#allocation6]  }
  0x31   :  { %s2669_s22 = smov [#allocation10]  }
  0x32   :  { %s73_s23 = sshll.u32 %s2669_s22, 4  ;;  %s74_s23 = int_to_ptr.vmem [resolvable:$true] %s73_s23 }
  0x33   :  { %s2645_s24 = scalar_lea.vmem %s74_s23, 16  ;;  %s2649_s25 = scalar_lea.vmem %s74_s23, 32 }
  0x34   :  { %p2646_p6 = scmp.ne.s32.totalorder %s74_s23, %s2645_s24  ;;  %p2650_p7 = scmp.lt.s32.totalorder %s74_s23, %s74_s23 }
  0x35   :  { %p2651_p8 = scmp.lt.s32.totalorder %s2649_s25, %s2645_s24 }
  0x37   :  { %p2652_p9 = por %p2651_p8, %p2650_p7 }
  0x39   :  { %p2653_p10 = pnand %p2652_p9, %p2646_p6 }
  0x3b   :  { %2656 = shalt.err (!%p2653_p10)
}
  0x3c   :  { %76 = dma.hbm_to_vmem [thread:$0]  %s3285_s6, 16, %s74_s23, [#allocation9]  }
  0x3d   :  { %2657 = dma.done.wait [#allocation4], 16  }
  0x3e   :  { %2658 = vsyncadd [#allocation4], 4294967280 }
  0x3f   :  { %2659 = dma.done.wait [#allocation6], 32  }
  0x40   :  { %2660 = vsyncadd [#allocation6], 4294967264 }
  0x41   :  { %2661 = dma.done.wait [#allocation9], 272  }
  0x42   :  { %2662 = vsyncadd [#allocation9], 4294967024  ;;  %v2670_v1 = vmov 0.0   ;;  %vm2671_vm0 = vmmov 0   ;;  %v2672_v2 = vmov 0   ;;  %v2766_v3 = vld [vmem:[%s3282_s3 + $0x8] sm:$0xff]  }
  0x43   :  { %2242 = vmatprep.subr.bf16.mxu0 %v2670_v1  ;;  %2246 = vmatprep.mubr.msk.bf16.mxu0 %vm2671_vm0, %v2670_v1  ;;  %v2772_v4 = vld [vmem:[%s3282_s3] sm:$0xff]   ;;  %v102_v7 = vld [vmem:[%s3279_s0 + $0x8] sm:$0xff]  ;;  %s2674_s14 = smov 32   ;;  %vm282_vm1 = vcmask 1041409   ;;  %vm158_vm2 = vcmask 261120   ;;  %vm2114_vm3 = vcmask 254976  }
  0x44   :  { %2447 = vset.pattern.permute.xlu1 %v2672_v2  ;;  %2446 = vset.pattern.permute.xlu0 %v2672_v2  ;;  %v2139_v5 = vld [vmem:[#allocation7] ss:$0 sm:$0xff]  ;;  %v2135_v16 = vld [vmem:[#allocation3] ss:$0 sm:$0xff]  ;;  %v2136_v19 = vld [vmem:[#allocation5] ss:$0 sm:$0xff] }
  0x45   :  { %2250 = vmatprep.subr.bf16.mxu1 %v2670_v1  ;;  %2254 = vmatprep.mubr.msk.bf16.mxu1 %vm2671_vm0, %v2670_v1  ;;  %v101_v6 = vld [vmem:[%s3279_s0] sm:$0xff]  ;;  %s2673_s0 = smov 96   ;;  %v2805_v48 = vld [vmem:[#allocation8 + $0x8] sm:$0xff]   ;;  %vm2126_vm4 = vcmask 1024  }
  0x46   :  { %2243 = vmatpush3.bf16.msra.mxu0 %v2766_v3  ;;  %221 = vrot.lane.b32.xlu0 %v2139_v5, %s2665_s27  ;;  %v2810_v49 = vld [vmem:[%s3286_s7 + $0x8] sm:$0xff]   ;;  %v2819_v53 = vld [vmem:[%s3286_s7] sm:$0xff]  }
  0x47   :  { %2244 = vmatprep.subr.bf16.mxu0 %v2670_v1  ;;  %106 = vperm.xlu1 %2447, %v101_v6   ;;  %v2814_v52 = vld [vmem:[#allocation8] sm:$0xff]  }
  0x48   :  { %2251 = vmatpush3.bf16.msra.mxu1 %v2805_v48 }
  0x49   :  { %2252 = vmatprep.subr.bf16.mxu1 %v2670_v1 }
  0x4a   :  { %2245 = vmatpush3.bf16.msra.mxu0 %v2772_v4  ;;  %111 = vperm.xlu0 %2446, %v102_v7  }
  0x4b   :  { %2258 = vmatprep.subr.bf16.mxu0 %v2670_v1 }
  0x4c   :  { %2253 = vmatpush3.bf16.msra.mxu1 %v2814_v52 }
  0x4d   :  { %2247 = vmatmul.mubr.bf16.vlgmr.msra.gmra.mxu0 %v2672_v2  ;;  %2266 = vmatprep.subr.bf16.mxu1 %v2670_v1 }
  0x4e   :  { %2262 = vmatprep.mubr.msk.bf16.mxu0 %vm2671_vm0, %v2670_v1  ;;  %2259 = vmatpush3.bf16.msra.mxu0 %v2810_v49 }
  0x4f   :  { %2260 = vmatprep.subr.bf16.mxu0 %v2670_v1 }
  0x52   :  { %2261 = vmatpush3.bf16.msra.mxu0 %v2819_v53 }
  0x53   :  { %2274 = vmatprep.subr.bf16.mxu0 %v2670_v1 }
  0x55   :  { %2263 = vmatmul.mubr.bf16.vlgmr.msra.gmra.mxu0 %v2672_v2 }
  0x56   :  { %2275 = vmatpush3.bf16.msra.mxu0 %v2805_v48  ;;  %2278 = vmatprep.mubr.msk.bf16.mxu0 %vm2671_vm0, %v2670_v1 }
  0x57   :  { %2276 = vmatprep.subr.bf16.mxu0 %v2670_v1 }
  0x5a   :  { %2277 = vmatpush3.bf16.msra.mxu0 %v2814_v52 }
  0x5b   :  { %2290 = vmatprep.subr.bf16.mxu0 %v2670_v1 }
  0xb8   :  { %v2787_v8 = vpop.permute.xlu0 %221 }
  0xc2   :  { %v107_v18 = vpop.permute.xlu1 %106 }
  0xc3   :  { %v120_v20 = vmul.f32 %v2135_v16, %v107_v18 }
  0xc5   :  { %v112_v15 = vpop.permute.xlu0 %111  ;;  %v2794_v23 = vadd.f32 %v2136_v19, %v120_v20  ;;  %v2146_v20 = vld [vmem:[%s3287_s8] ss:$0 sm:$0xff] }
  0xc6   :  { %v121_v17 = vmul.f32 %v2135_v16, %v112_v15 }
  0xc8   :  { %v2792_v21 = vadd.f32 %v2136_v19, %v121_v17 }
 0x10d   :  { %v196_v9 = vpop.f32.mrf.mxu0 }
 0x10e   :  { %v224_v10 = vadd.f32 %v2787_v8, %v196_v9  ;;  %v203_v22 = vrot.slane %v196_v9, 1  ;;  %v206_v25 = vadd.f32 %v196_v9, %v2794_v23 }
 0x10f   :  { %v2248_v11 = vpop.f32.mrf.mxu0 }
 0x110   :  { %v226_v12 = vrot.slane %v224_v10, 1  ;;  %v207_v24 = vadd.f32 %v203_v22, %v2792_v21  ;;  %v208_v27 = vmul.f32 0.5, %v206_v25 }
 0x111   :  { %v199_v13 = vpop.f32.mrf.mxu0 }
 0x112   :  { %229 = vrot.lane.b32.xlu1 %v226_v12, %s2665_s27  ;;  %v209_v26 = vmul.f32 0.5, %v207_v24 }
 0x113   :  { %v2249_v14 = vpop.f32.mrf.mxu0 }
 0x114   :  { %2454 = vtanh.f32 %v209_v26 }
 0x115   :  { %2456 = vtanh.f32 %v208_v27  ;;  %v388_v5 = vpop.f32.mrf.mxu0 }
 0x116   :  { %227 = vrot.lane.b32.xlu1 %v224_v10, %s2665_s27 }
 0x117   :  { %v2264_v6 = vpop.f32.mrf.mxu0 }
 0x119   :  { %v391_v7 = vpop.f32.mrf.mxu0 }
 0x11b   :  { %v2265_v9 = vpop.f32.mrf.mxu0 }
 0x121   :  { %v2455_v28 = vpop.eup %2454 }
 0x122   :  { %v213_v29 = vmul.f32 0.5, %v2455_v28  ;;  %v2457_v30 = vpop.eup %2456 }
 0x123   :  { %v212_v32 = vmul.f32 0.5, %v2457_v30 }
 0x124   :  { %v215_v31 = vadd.f32 0.5, %v213_v29 }
 0x125   :  { %v214_v35 = vadd.f32 0.5, %v212_v32 }
 0x184   :  { %v230_v33 = vpop.permute.xlu1 %229 }
 0x185   :  { %v234_v34 = vmul.f32 %v230_v33, %v215_v31 }
 0x187   :  { %239 = vrot.lane.b32.xlu0 %v234_v34, %s2665_s27 }
 0x188   :  { %v228_v36 = vpop.permute.xlu1 %227 }
 0x189   :  { %v233_v37 = vmul.f32 %v228_v36, %v214_v35 }
 0x18b   :  { %237 = vrot.lane.b32.xlu1 %v233_v37, %s2665_s27 }
 0x1f9   :  { %v240_v38 = vpop.permute.xlu0 %239 }
 0x1fa   :  { %v244_v39 = vadd.f32 %v240_v38, %v2792_v21 }
 0x1fc   :  { %2458 = vtanh.f32 %v244_v39 }
 0x1fd   :  { %v238_v40 = vpop.permute.xlu1 %237 }
 0x1fe   :  { %v243_v41 = vadd.f32 %v238_v40, %v2794_v23  ;;  %v2874_v40 = vld [vmem:[#allocation10] ss:$0 sm:$0xff] }
 0x200   :  { %2460 = vtanh.f32 %v243_v41 }
 0x209   :  { %v2459_v42 = vpop.eup %2458 }
 0x20a   :  { %v248_v43 = vsub.f32 0.0, %v2459_v42 }
 0x20c   :  { %253 = vrot.lane.b32.xlu0 %v248_v43, %s2673_s0 }
 0x20d   :  { %v2461_v44 = vpop.eup %2460 }
 0x20e   :  { %v247_v45 = vsub.f32 0.0, %v2461_v44 }
 0x210   :  { %251 = vrot.lane.b32.xlu1 %v247_v45, %s2673_s0 }
 0x27e   :  { %v254_v46 = vpop.permute.xlu0 %253 }
 0x27f   :  { %v258_v47 = vmul.f32 %v254_v46, %v215_v31 }
 0x281   :  { %263 = vrot.lane.b32.xlu0 %v258_v47, %s2674_s14 }
 0x282   :  { %v252_v50 = vpop.permute.xlu1 %251 }
 0x283   :  { %v257_v51 = vmul.f32 %v252_v50, %v214_v35 }
 0x285   :  { %261 = vrot.lane.b32.xlu1 %v257_v51, %s2674_s14 }
 0x2f3   :  { %v264_v54 = vpop.permute.xlu0 %263 }
 0x2f4   :  { %v2835_v55 = vadd.f32 %v2459_v42, %v264_v54 }
 0x2f6   :  { %v270_v56 = vpack.c.bf16 %v2835_v55, %v2835_v55 }
 0x2f7   :  { %v262_v57 = vpop.permute.xlu1 %261 }
 0x2f8   :  { %v280_v58 = vunpack.c.l.b16 %v270_v56  ;;  %v2839_v59 = vadd.f32 %v2461_v44, %v262_v57 }
 0x2fa   :  { %v269_v60 = vpack.c.bf16 %v2839_v59, %v2839_v59  ;;  %v281_v61 = vrot.slane %v280_v58, 7 }
 0x2fc   :  { %v279_v62 = vunpack.c.l.b16 %v269_v60 }
 0x2fe   :  { %v283_v63 = vsel %vm282_vm1, %v281_v61, %v279_v62 }
 0x2ff   :  { %v284_v0 = vpack.c.b16 %v283_v63, %v283_v63 }
 0x301   :  { %285 = vrot.lane.b32.xlu0 %v284_v0, %s2665_s27 }
 0x373   :  { %v286_v2 = vpop.permute.xlu0 %285 }
 0x374   :  { %2255 = vmatmul.mubr.msk.bf16.vlgmr.msra.gmra.mxu1 %vm158_vm2, %v286_v2 }
 0x375   :  { %2267 = vmatpush3.bf16.msra.mxu1 %v2766_v3  ;;  %2270 = vmatprep.mubr.msk.bf16.mxu1 %vm2671_vm0, %v2670_v1 }
 0x376   :  { %2268 = vmatprep.subr.bf16.mxu1 %v2670_v1 }
 0x379   :  { %2269 = vmatpush3.bf16.msra.mxu1 %v2772_v4 }
 0x37a   :  { %2282 = vmatprep.subr.bf16.mxu1 %v2670_v1 }
 0x37c   :  { %2271 = vmatmul.mubr.msk.bf16.vlgmr.msra.gmra.mxu1 %vm158_vm2, %v286_v2 }
 0x37d   :  { %2283 = vmatpush3.bf16.msra.mxu1 %v2810_v49  ;;  %2286 = vmatprep.mubr.msk.bf16.mxu1 %vm2671_vm0, %v2670_v1 }
 0x37e   :  { %2284 = vmatprep.subr.bf16.mxu1 %v2670_v1 }
 0x381   :  { %2285 = vmatpush3.bf16.msra.mxu1 %v2819_v53 }
 0x382   :  { %2298 = vmatprep.subr.bf16.mxu1 %v2670_v1 }
 0x434   :  { %v336_v10 = vpop.f32.mrf.mxu1 }
 0x435   :  { %v337_v41 = vadd.f32 %v2874_v40, %v336_v10 }
 0x436   :  { %v2256_v11 = vpop.f32.mrf.mxu1 }
 0x437   :  { %v394_v42 = vadd.f32 %v388_v5, %v337_v41 }
 0x438   :  { %v339_v12 = vpop.f32.mrf.mxu1 }
 0x439   :  { %v395_v43 = vmul.f32 0.5, %v394_v42 }
 0x43a   :  { %v2257_v13 = vpop.f32.mrf.mxu1 }
 0x43c   :  { %v464_v14 = vpop.f32.mrf.mxu1 }
 0x43d   :  { %v484_v15 = vadd.f32 %v464_v14, %v2787_v8  ;;  %v471_v22 = vrot.slane %v464_v14, 7  ;;  %v475_v24 = vadd.f32 %v464_v14, %v2792_v21 }
 0x43e   :  { %v2272_v16 = vpop.f32.mrf.mxu1 }
 0x43f   :  { %489 = vrot.lane.b32.xlu0 %v484_v15, %s2665_s27  ;;  %v486_v17 = vrot.slane %v484_v15, 7  ;;  %v474_v25 = vadd.f32 %v471_v22, %v2794_v23  ;;  %v477_v26 = vmul.f32 0.5, %v475_v24 }
 0x440   :  { %v467_v18 = vpop.f32.mrf.mxu1 }
 0x441   :  { %487 = vrot.lane.b32.xlu1 %v486_v17, %s2665_s27  ;;  %v476_v27 = vmul.f32 0.5, %v474_v25  ;;  %2462 = vtanh.f32 %v477_v26 }
 0x442   :  { %v2273_v19 = vpop.f32.mrf.mxu1 }
 0x443   :  { %2464 = vtanh.f32 %v476_v27 }
 0x445   :  { %404 = vrot.lane.b32.xlu1 %v2146_v20, %s2665_s27 }
 0x44e   :  { %v2463_v28 = vpop.eup %2462 }
 0x44f   :  { %v481_v30 = vmul.f32 0.5, %v2463_v28 }
 0x450   :  { %v2465_v29 = vpop.eup %2464 }
 0x451   :  { %v480_v31 = vmul.f32 0.5, %v2465_v29  ;;  %v483_v32 = vadd.f32 0.5, %v481_v30 }
 0x453   :  { %v482_v35 = vadd.f32 0.5, %v480_v31 }
 0x4b1   :  { %v490_v33 = vpop.permute.xlu0 %489 }
 0x4b2   :  { %v494_v34 = vmul.f32 %v490_v33, %v483_v32 }
 0x4b3   :  { %v488_v36 = vpop.permute.xlu1 %487 }
 0x4b4   :  { %499 = vrot.lane.b32.xlu1 %v494_v34, %s2665_s27  ;;  %v493_v37 = vmul.f32 %v488_v36, %v482_v35 }
 0x4b6   :  { %497 = vrot.lane.b32.xlu0 %v493_v37, %s2665_s27 }
 0x4b7   :  { %v2870_v38 = vpop.permute.xlu1 %404 }
 0x4b8   :  { %v407_v39 = vadd.f32 %v2870_v38, %v388_v5 }
 0x4ba   :  { %409 = vrot.lane.b32.xlu0 %v407_v39, %s2665_s27 }
 0x526   :  { %v500_v44 = vpop.permute.xlu1 %499 }
 0x527   :  { %v504_v45 = vadd.f32 %v500_v44, %v2792_v21 }
 0x528   :  { %v498_v46 = vpop.permute.xlu0 %497 }
 0x529   :  { %2466 = vtanh.f32 %v504_v45  ;;  %v503_v47 = vadd.f32 %v498_v46, %v2794_v23 }
 0x52a   :  { %2468 = vtanh.f32 %v395_v43 }
 0x52b   :  { %2470 = vtanh.f32 %v503_v47 }
 0x52c   :  { %v410_v0 = vpop.permute.xlu0 %409 }
 0x536   :  { %v2467_v50 = vpop.eup %2466 }
 0x537   :  { %v2469_v51 = vpop.eup %2468  ;;  %v510_v54 = vrot.slane %v2467_v50, 1 }
 0x538   :  { %v2471_v56 = vpop.eup %2470  ;;  %v397_v62 = vmul.f32 0.5, %v2469_v51 }
 0x539   :  { %v514_v57 = vsub.f32 %v2835_v55, %v510_v54  ;;  %v509_v58 = vrot.slane %v2471_v56, 1 }
 0x53a   :  { %v398_v2 = vadd.f32 0.5, %v397_v62 }
 0x53b   :  { %v518_v60 = vrot.slane %v514_v57, 7  ;;  %v513_v61 = vsub.f32 %v2839_v59, %v509_v58 }
 0x53c   :  { %v412_v5 = vmul.f32 %v410_v0, %v398_v2 }
 0x53d   :  { %521 = vrot.lane.b32.xlu0 %v518_v60, %s2673_s0  ;;  %v517_v63 = vrot.slane %v513_v61, 7 }
 0x53f   :  { %519 = vrot.lane.b32.xlu1 %v517_v63, %s2673_s0 }
 0x543   :  { %414 = vrot.lane.b32.xlu1 %v412_v5, %s2665_s27 }
 0x5af   :  { %v522_v6 = vpop.permute.xlu0 %521 }
 0x5b0   :  { %v526_v7 = vmul.f32 %v522_v6, %v483_v32 }
 0x5b1   :  { %v520_v9 = vpop.permute.xlu1 %519 }
 0x5b2   :  { %v525_v10 = vmul.f32 %v520_v9, %v482_v35  ;;  %531 = vrot.lane.b32.xlu1 %v526_v7, %s2674_s14 }
 0x5b4   :  { %529 = vrot.lane.b32.xlu0 %v525_v10, %s2674_s14 }
 0x5b5   :  { %v415_v55 = vpop.permute.xlu1 %414 }
 0x5b6   :  { %v417_v59 = vadd.f32 %v415_v55, %v337_v41 }
 0x5b8   :  { %2472 = vtanh.f32 %v417_v59 }
 0x5c5   :  { %v2473_v11 = vpop.eup %2472 }
 0x5c6   :  { %v419_v12 = vsub.f32 0.0, %v2473_v11 }
 0x5c8   :  { %421 = vrot.lane.b32.xlu0 %v419_v12, %s2673_s0 }
 0x624   :  { %v532_v13 = vpop.permute.xlu1 %531 }
 0x625   :  { %v2887_v14 = vadd.f32 %v2467_v50, %v532_v13 }
 0x626   :  { %v530_v15 = vpop.permute.xlu0 %529 }
 0x627   :  { %v2889_v16 = vadd.f32 %v2471_v56, %v530_v15  ;;  %v538_v17 = vpack.c.bf16 %v2887_v14, %v2887_v14 }
 0x629   :  { %v537_v18 = vpack.c.bf16 %v2889_v16, %v2889_v16  ;;  %v542_v20 = vunpack.c.l.b16 %v538_v17 }
 0x62b   :  { %v541_v19 = vunpack.c.l.b16 %v537_v18 }
 0x62d   :  { %v543_v22 = vrot.slane %v541_v19, 1 }
 0x62f   :  { %v544_v24 = vsel %vm282_vm1, %v542_v20, %v543_v22 }
 0x630   :  { %v545_v25 = vpack.c.b16 %v544_v24, %v544_v24 }
 0x632   :  { %546 = vrot.lane.b32.xlu1 %v545_v25, %s2665_s27 }
 0x63a   :  { %v422_v26 = vpop.permute.xlu0 %421 }
 0x63b   :  { %v424_v27 = vmul.f32 %v422_v26, %v398_v2 }
 0x63d   :  { %426 = vrot.lane.b32.xlu0 %v424_v27, %s2674_s14 }
 0x6a4   :  { %v547_v28 = vpop.permute.xlu1 %546 }
 0x6a5   :  { %2279 = vmatmul.mubr.msk.bf16.vlgmr.msra.gmra.mxu0 %vm158_vm2, %v547_v28 }
 0x6a6   :  { %2291 = vmatpush3.bf16.msra.mxu0 %v2766_v3  ;;  %2294 = vmatprep.mubr.msk.bf16.mxu0 %vm2671_vm0, %v2670_v1 }
 0x6a7   :  { %2292 = vmatprep.subr.bf16.mxu0 %v2670_v1 }
 0x6aa   :  { %2293 = vmatpush3.bf16.msra.mxu0 %v2772_v4 }
 0x6ab   :  { %2306 = vmatprep.subr.bf16.mxu0 %v2670_v1 }
 0x6ad   :  { %2295 = vmatmul.mubr.msk.bf16.vlgmr.msra.gmra.mxu0 %vm158_vm2, %v547_v28 }
 0x6ae   :  { %2307 = vmatpush3.bf16.msra.mxu0 %v2810_v49  ;;  %2310 = vmatprep.mubr.msk.bf16.mxu0 %vm2671_vm0, %v2670_v1 }
 0x6af   :  { %v427_v29 = vpop.permute.xlu0 %426  ;;  %2308 = vmatprep.subr.bf16.mxu0 %v2670_v1 }
 0x6b0   :  { %v2910_v30 = vadd.f32 %v2473_v11, %v427_v29 }
 0x6b2   :  { %v591_v31 = vpack.c.bf16 %v2910_v30, %v2910_v30  ;;  %2309 = vmatpush3.bf16.msra.mxu0 %v2819_v53 }
 0x6b3   :  { %2322 = vmatprep.subr.bf16.mxu0 %v2670_v1 }
 0x6b4   :  { %593 = vrot.lane.b32.xlu1 %v591_v31, %s2665_s27 }
 0x726   :  { %v594_v32 = vpop.permute.xlu1 %593 }
 0x727   :  { %2287 = vmatmul.mubr.msk.bf16.vlgmr.msra.gmra.mxu1 %vm158_vm2, %v594_v32 }
 0x728   :  { %2299 = vmatpush3.bf16.msra.mxu1 %v2805_v48  ;;  %2302 = vmatprep.mubr.msk.bf16.mxu1 %vm2671_vm0, %v2670_v1 }
 0x729   :  { %2300 = vmatprep.subr.bf16.mxu1 %v2670_v1 }
 0x72c   :  { %2301 = vmatpush3.bf16.msra.mxu1 %v2814_v52 }
 0x72d   :  { %2314 = vmatprep.subr.bf16.mxu1 %v2670_v1 }
 0x765   :  { %v585_v33 = vpop.f32.mrf.mxu0 }
 0x766   :  { %v586_v11 = vadd.f32 %v2874_v40, %v585_v33 }
 0x767   :  { %v2280_v34 = vpop.f32.mrf.mxu0 }
 0x769   :  { %v588_v35 = vpop.f32.mrf.mxu0 }
 0x76b   :  { %v2281_v36 = vpop.f32.mrf.mxu0 }
 0x76d   :  { %v700_v37 = vpop.f32.mrf.mxu0 }
 0x76e   :  { %v721_v39 = vadd.f32 %v700_v37, %v2787_v8  ;;  %v708_v46 = vrot.slane %v700_v37, 7  ;;  %v707_v47 = vrot.slane %v700_v37, 6 }
 0x76f   :  { %v2296_v41 = vpop.f32.mrf.mxu0 }
 0x770   :  { %v723_v42 = vrot.slane %v721_v39, 6  ;;  %v724_v43 = vrot.slane %v721_v39, 7  ;;  %v712_v50 = vadd.f32 %v708_v46, %v2792_v21  ;;  %v711_v51 = vadd.f32 %v707_v47, %v2794_v23 }
 0x771   :  { %v703_v44 = vpop.f32.mrf.mxu0 }
 0x772   :  { %725 = vrot.lane.b32.xlu0 %v723_v42, %s2665_s27  ;;  %727 = vrot.lane.b32.xlu1 %v724_v43, %s2665_s27  ;;  %v714_v54 = vmul.f32 0.5, %v712_v50  ;;  %v713_v56 = vmul.f32 0.5, %v711_v51 }
 0x773   :  { %v2297_v45 = vpop.f32.mrf.mxu0 }
 0x774   :  { %2474 = vtanh.f32 %v714_v54 }
 0x775   :  { %2476 = vtanh.f32 %v713_v56 }
 0x781   :  { %v2475_v57 = vpop.eup %2474 }
 0x782   :  { %v2477_v58 = vpop.eup %2476  ;;  %v718_v60 = vmul.f32 0.5, %v2475_v57 }
 0x783   :  { %v717_v61 = vmul.f32 0.5, %v2477_v58 }
 0x784   :  { %v720_v62 = vadd.f32 0.5, %v718_v60 }
 0x785   :  { %v719_v63 = vadd.f32 0.5, %v717_v61 }
 0x7e4   :  { %v728_v0 = vpop.permute.xlu1 %727  ;;  %v726_v2 = vpop.permute.xlu0 %725 }
 0x7e5   :  { %v732_v5 = vmul.f32 %v728_v0, %v720_v62  ;;  %v731_v6 = vmul.f32 %v726_v2, %v719_v63 }
 0x7e7   :  { %737 = vrot.lane.b32.xlu1 %v732_v5, %s2665_s27  ;;  %735 = vrot.lane.b32.xlu0 %v731_v6, %s2665_s27  ;;  %v632_v7 = vpop.f32.mrf.mxu1 }
 0x7e8   :  { %v643_v9 = vadd.f32 %v632_v7, %v2870_v38  ;;  %v638_v12 = vadd.f32 %v632_v7, %v586_v11 }
 0x7e9   :  { %v2288_v10 = vpop.f32.mrf.mxu1 }
 0x7ea   :  { %v639_v13 = vmul.f32 0.5, %v638_v12 }
 0x7eb   :  { %645 = vrot.lane.b32.xlu0 %v643_v9, %s2665_s27  ;;  %v635_v55 = vpop.f32.mrf.mxu1 }
 0x7ec   :  { %2478 = vtanh.f32 %v639_v13 }
 0x7ed   :  { %v2289_v59 = vpop.f32.mrf.mxu1 }
 0x7f9   :  { %v2479_v15 = vpop.eup %2478 }
 0x7fa   :  { %v641_v17 = vmul.f32 0.5, %v2479_v15 }
 0x7fc   :  { %v642_v24 = vadd.f32 0.5, %v641_v17 }
 0x859   :  { %v738_v18 = vpop.permute.xlu1 %737  ;;  %v736_v19 = vpop.permute.xlu0 %735 }
 0x85a   :  { %v742_v20 = vadd.f32 %v738_v18, %v2792_v21  ;;  %v741_v22 = vadd.f32 %v736_v19, %v2794_v23 }
 0x85c   :  { %2480 = vtanh.f32 %v742_v20 }
 0x85d   :  { %2482 = vtanh.f32 %v741_v22  ;;  %v646_v25 = vpop.permute.xlu0 %645 }
 0x85e   :  { %v648_v26 = vmul.f32 %v646_v25, %v642_v24 }
 0x860   :  { %650 = vrot.lane.b32.xlu1 %v648_v26, %s2665_s27 }
 0x869   :  { %v2481_v27 = vpop.eup %2480 }
 0x86a   :  { %v2483_v28 = vpop.eup %2482  ;;  %v748_v29 = vrot.slane %v2481_v27, 1 }
 0x86b   :  { %v747_v31 = vrot.slane %v2483_v28, 1 }
 0x86c   :  { %v752_v32 = vsub.f32 %v2887_v14, %v748_v29 }
 0x86d   :  { %v751_v33 = vsub.f32 %v2889_v16, %v747_v31 }
 0x86e   :  { %v756_v34 = vrot.slane %v752_v32, 7 }
 0x86f   :  { %v755_v35 = vrot.slane %v751_v33, 7 }
 0x870   :  { %759 = vrot.lane.b32.xlu1 %v756_v34, %s2673_s0 }
 0x871   :  { %757 = vrot.lane.b32.xlu0 %v755_v35, %s2673_s0 }
 0x8d2   :  { %v651_v36 = vpop.permute.xlu1 %650 }
 0x8d3   :  { %v653_v37 = vadd.f32 %v651_v36, %v586_v11 }
 0x8d5   :  { %2484 = vtanh.f32 %v653_v37 }
 0x8e2   :  { %v760_v39 = vpop.permute.xlu1 %759  ;;  %v2485_v44 = vpop.eup %2484 }
 0x8e3   :  { %v758_v41 = vpop.permute.xlu0 %757  ;;  %v764_v42 = vmul.f32 %v760_v39, %v720_v62  ;;  %v655_v14 = vsub.f32 %v2910_v30, %v2485_v44 }
 0x8e4   :  { %v763_v43 = vmul.f32 %v758_v41, %v719_v63 }
 0x8e5   :  { %769 = vrot.lane.b32.xlu1 %v764_v42, %s2674_s14 }
 0x8e6   :  { %767 = vrot.lane.b32.xlu0 %v763_v43, %s2674_s14 }
 0x8ea   :  { %657 = vrot.lane.b32.xlu0 %v655_v14, %s2673_s0 }
 0x957   :  { %v770_v16 = vpop.permute.xlu1 %769 }
 0x958   :  { %v768_v45 = vpop.permute.xlu0 %767  ;;  %v2945_v46 = vadd.f32 %v2481_v27, %v770_v16 }
 0x959   :  { %v2947_v47 = vadd.f32 %v2483_v28, %v768_v45 }
 0x95a   :  { %v776_v50 = vpack.c.bf16 %v2945_v46, %v2945_v46 }
 0x95b   :  { %v775_v51 = vpack.c.bf16 %v2947_v47, %v2947_v47 }
 0x95c   :  { %v780_v54 = vunpack.c.l.b16 %v776_v50  ;;  %v658_v56 = vpop.permute.xlu0 %657 }
 0x95d   :  { %v779_v57 = vunpack.c.l.b16 %v775_v51  ;;  %v660_v58 = vmul.f32 %v658_v56, %v642_v24 }
 0x95e   :  { %v782_v60 = vrot.slane %v780_v54, 1 }
 0x95f   :  { %v781_v30 = vrot.slane %v779_v57, 2  ;;  %662 = vrot.lane.b32.xlu0 %v660_v58, %s2674_s14 }
 0x961   :  { %v783_v61 = vsel %vm282_vm1, %v782_v60, %v781_v30 }
 0x962   :  { %v784_v62 = vpack.c.b16 %v783_v61, %v783_v61 }
 0x964   :  { %785 = vrot.lane.b32.xlu1 %v784_v62, %s2665_s27 }
 0x9d1   :  { %v663_v63 = vpop.permute.xlu0 %662 }
 0x9d2   :  { %v2956_v0 = vadd.f32 %v2485_v44, %v663_v63 }
 0x9d4   :  { %v830_v2 = vpack.c.bf16 %v2956_v0, %v2956_v0 }
 0x9d6   :  { %832 = vrot.lane.b32.xlu1 %v830_v2, %s2665_s27  ;;  %v786_v5 = vpop.permute.xlu1 %785 }
 0x9d7   :  { %2303 = vmatmul.mubr.msk.bf16.vlgmr.msra.gmra.mxu1 %vm158_vm2, %v786_v5 }
 0x9d8   :  { %2315 = vmatpush3.bf16.msra.mxu1 %v2766_v3  ;;  %2318 = vmatprep.mubr.msk.bf16.mxu1 %vm2671_vm0, %v2670_v1 }
 0x9d9   :  { %2316 = vmatprep.subr.bf16.mxu1 %v2670_v1 }
 0x9dc   :  { %2317 = vmatpush3.bf16.msra.mxu1 %v2772_v4 }
 0x9dd   :  { %2330 = vmatprep.subr.bf16.mxu1 %v2670_v1 }
 0x9df   :  { %2319 = vmatmul.mubr.msk.bf16.vlgmr.msra.gmra.mxu1 %vm158_vm2, %v786_v5 }
 0x9e0   :  { %2331 = vmatpush3.bf16.msra.mxu1 %v2810_v49  ;;  %2334 = vmatprep.mubr.msk.bf16.mxu1 %vm2671_vm0, %v2670_v1 }
 0x9e1   :  { %2332 = vmatprep.subr.bf16.mxu1 %v2670_v1 }
 0x9e4   :  { %2333 = vmatpush3.bf16.msra.mxu1 %v2819_v53 }
 0x9e5   :  { %2346 = vmatprep.subr.bf16.mxu1 %v2670_v1 }
 0xa48   :  { %v833_v6 = vpop.permute.xlu1 %832 }
 0xa49   :  { %2311 = vmatmul.mubr.msk.bf16.vlgmr.msra.gmra.mxu0 %vm158_vm2, %v833_v6 }
 0xa4a   :  { %2323 = vmatpush3.bf16.msra.mxu0 %v2805_v48  ;;  %2326 = vmatprep.mubr.msk.bf16.mxu0 %vm2671_vm0, %v2670_v1 }
 0xa4b   :  { %2324 = vmatprep.subr.bf16.mxu0 %v2670_v1 }
 0xa4e   :  { %2325 = vmatpush3.bf16.msra.mxu0 %v2814_v52 }
 0xa4f   :  { %2338 = vmatprep.subr.bf16.mxu0 %v2670_v1 }
 0xa97   :  { %v824_v7 = vpop.f32.mrf.mxu1 }
 0xa98   :  { %v825_v14 = vadd.f32 %v2874_v40, %v824_v7 }
 0xa99   :  { %v2304_v9 = vpop.f32.mrf.mxu1 }
 0xa9b   :  { %v827_v10 = vpop.f32.mrf.mxu1 }
 0xa9d   :  { %v2305_v55 = vpop.f32.mrf.mxu1 }
 0xa9f   :  { %v939_v59 = vpop.f32.mrf.mxu1 }
 0xaa0   :  { %v960_v11 = vadd.f32 %v939_v59, %v2787_v8  ;;  %v947_v19 = vrot.slane %v939_v59, 6  ;;  %v946_v20 = vrot.slane %v939_v59, 5 }
 0xaa1   :  { %v2320_v12 = vpop.f32.mrf.mxu1 }
 0xaa2   :  { %v963_v13 = vrot.slane %v960_v11, 6  ;;  %v962_v15 = vrot.slane %v960_v11, 5  ;;  %v951_v22 = vadd.f32 %v947_v19, %v2792_v21  ;;  %v950_v24 = vadd.f32 %v946_v20, %v2794_v23 }
 0xaa3   :  { %v942_v17 = vpop.f32.mrf.mxu1 }
 0xaa4   :  { %966 = vrot.lane.b32.xlu1 %v963_v13, %s2665_s27  ;;  %964 = vrot.lane.b32.xlu0 %v962_v15, %s2665_s27  ;;  %v953_v25 = vmul.f32 0.5, %v951_v22  ;;  %v952_v26 = vmul.f32 0.5, %v950_v24 }
 0xaa5   :  { %v2321_v18 = vpop.f32.mrf.mxu1 }
 0xaa6   :  { %2486 = vtanh.f32 %v953_v25 }
 0xaa7   :  { %2488 = vtanh.f32 %v952_v26 }
 0xab3   :  { %v2487_v31 = vpop.eup %2486 }
 0xab4   :  { %v2489_v33 = vpop.eup %2488  ;;  %v957_v35 = vmul.f32 0.5, %v2487_v31 }
 0xab5   :  { %v956_v36 = vmul.f32 0.5, %v2489_v33 }
 0xab6   :  { %v959_v37 = vadd.f32 0.5, %v957_v35 }
 0xab7   :  { %v958_v39 = vadd.f32 0.5, %v956_v36 }
 0xb09   :  { %v871_v27 = vpop.f32.mrf.mxu0 }
 0xb0a   :  { %v882_v28 = vadd.f32 %v871_v27, %v2870_v38  ;;  %v877_v16 = vadd.f32 %v871_v27, %v825_v14 }
 0xb0b   :  { %v2312_v29 = vpop.f32.mrf.mxu0 }
 0xb0c   :  { %884 = vrot.lane.b32.xlu0 %v882_v28, %s2665_s27  ;;  %v878_v45 = vmul.f32 0.5, %v877_v16 }
 0xb0d   :  { %v874_v32 = vpop.f32.mrf.mxu0 }
 0xb0e   :  { %2490 = vtanh.f32 %v878_v45 }
 0xb0f   :  { %v2313_v34 = vpop.f32.mrf.mxu0 }
 0xb16   :  { %v967_v41 = vpop.permute.xlu1 %966  ;;  %v965_v42 = vpop.permute.xlu0 %964 }
 0xb17   :  { %v971_v43 = vmul.f32 %v967_v41, %v959_v37  ;;  %v970_v44 = vmul.f32 %v965_v42, %v958_v39 }
 0xb19   :  { %976 = vrot.lane.b32.xlu0 %v971_v43, %s2665_s27  ;;  %974 = vrot.lane.b32.xlu1 %v970_v44, %s2665_s27 }
 0xb1b   :  { %v2491_v50 = vpop.eup %2490 }
 0xb1c   :  { %v880_v51 = vmul.f32 0.5, %v2491_v50 }
 0xb1e   :  { %v881_v54 = vadd.f32 0.5, %v880_v51 }
 0xb7e   :  { %v885_v56 = vpop.permute.xlu0 %884 }
 0xb7f   :  { %v887_v57 = vmul.f32 %v885_v56, %v881_v54 }
 0xb81   :  { %889 = vrot.lane.b32.xlu1 %v887_v57, %s2665_s27 }
 0xb8b   :  { %v977_v58 = vpop.permute.xlu0 %976  ;;  %v975_v60 = vpop.permute.xlu1 %974 }
 0xb8c   :  { %v981_v30 = vadd.f32 %v977_v58, %v2792_v21  ;;  %v980_v61 = vadd.f32 %v975_v60, %v2794_v23 }
 0xb8e   :  { %2492 = vtanh.f32 %v981_v30 }
 0xb8f   :  { %2494 = vtanh.f32 %v980_v61 }
 0xb9b   :  { %v2493_v62 = vpop.eup %2492 }
 0xb9c   :  { %v2495_v63 = vpop.eup %2494  ;;  %v987_v2 = vrot.slane %v2493_v62, 1 }
 0xb9d   :  { %v986_v5 = vrot.slane %v2495_v63, 1 }
 0xb9e   :  { %v991_v6 = vsub.f32 %v2945_v46, %v987_v2 }
 0xb9f   :  { %v990_v7 = vsub.f32 %v2947_v47, %v986_v5 }
 0xba0   :  { %v995_v9 = vrot.slane %v991_v6, 7 }
 0xba1   :  { %v994_v10 = vrot.slane %v990_v7, 7 }
 0xba2   :  { %998 = vrot.lane.b32.xlu1 %v995_v9, %s2673_s0 }
 0xba3   :  { %996 = vrot.lane.b32.xlu0 %v994_v10, %s2673_s0 }
 0xbf3   :  { %v890_v55 = vpop.permute.xlu1 %889 }
 0xbf4   :  { %v892_v59 = vadd.f32 %v890_v55, %v825_v14 }
 0xbf6   :  { %2496 = vtanh.f32 %v892_v59 }
 0xc03   :  { %v2497_v11 = vpop.eup %2496 }
 0xc04   :  { %v894_v12 = vsub.f32 %v2956_v0, %v2497_v11 }
 0xc06   :  { %896 = vrot.lane.b32.xlu0 %v894_v12, %s2673_s0 }
 0xc14   :  { %v999_v13 = vpop.permute.xlu1 %998 }
 0xc15   :  { %v997_v15 = vpop.permute.xlu0 %996  ;;  %v1003_v17 = vmul.f32 %v999_v13, %v959_v37 }
 0xc16   :  { %v1002_v46 = vmul.f32 %v997_v15, %v958_v39 }
 0xc17   :  { %1008 = vrot.lane.b32.xlu0 %v1003_v17, %s2674_s14 }
 0xc18   :  { %1006 = vrot.lane.b32.xlu1 %v1002_v46, %s2674_s14 }
 0xc78   :  { %v897_v47 = vpop.permute.xlu0 %896 }
 0xc79   :  { %v899_v18 = vmul.f32 %v897_v47, %v881_v54 }
 0xc7b   :  { %901 = vrot.lane.b32.xlu1 %v899_v18, %s2674_s14 }
 0xc89   :  { %v1009_v19 = vpop.permute.xlu0 %1008 }
 0xc8a   :  { %v3004_v20 = vadd.f32 %v2493_v62, %v1009_v19  ;;  %v1007_v22 = vpop.permute.xlu1 %1006 }
 0xc8b   :  { %v3006_v24 = vadd.f32 %v2495_v63, %v1007_v22 }
 0xc8c   :  { %v1015_v0 = vpack.c.bf16 %v3004_v20, %v3004_v20 }
 0xc8d   :  { %v1014_v25 = vpack.c.bf16 %v3006_v24, %v3006_v24 }
 0xc8e   :  { %v1019_v26 = vunpack.c.l.b16 %v1015_v0 }
 0xc8f   :  { %v1018_v27 = vunpack.c.l.b16 %v1014_v25 }
 0xc90   :  { %v1021_v28 = vrot.slane %v1019_v26, 2 }
 0xc91   :  { %v1020_v29 = vrot.slane %v1018_v27, 3 }
 0xc93   :  { %v1022_v31 = vsel %vm282_vm1, %v1021_v28, %v1020_v29 }
 0xc94   :  { %v1023_v32 = vpack.c.b16 %v1022_v31, %v1022_v31 }
 0xc96   :  { %1024 = vrot.lane.b32.xlu0 %v1023_v32, %s2665_s27 }
 0xced   :  { %v902_v33 = vpop.permute.xlu1 %901 }
 0xcee   :  { %v3014_v34 = vadd.f32 %v2497_v11, %v902_v33 }
 0xcf0   :  { %v1069_v35 = vpack.c.bf16 %v3014_v34, %v3014_v34 }
 0xcf2   :  { %1071 = vrot.lane.b32.xlu1 %v1069_v35, %s2665_s27 }
 0xd08   :  { %v1025_v36 = vpop.permute.xlu0 %1024 }
 0xd09   :  { %2327 = vmatmul.mubr.msk.bf16.vlgmr.msra.gmra.mxu0 %vm158_vm2, %v1025_v36 }
 0xd0a   :  { %2339 = vmatpush3.bf16.msra.mxu0 %v2766_v3  ;;  %2342 = vmatprep.mubr.msk.bf16.mxu0 %vm2671_vm0, %v2670_v1 }
 0xd0b   :  { %2340 = vmatprep.subr.bf16.mxu0 %v2670_v1 }
 0xd0e   :  { %2341 = vmatpush3.bf16.msra.mxu0 %v2772_v4 }
 0xd0f   :  { %2354 = vmatprep.subr.bf16.mxu0 %v2670_v1 }
 0xd11   :  { %2343 = vmatmul.mubr.msk.bf16.vlgmr.msra.gmra.mxu0 %vm158_vm2, %v1025_v36 }
 0xd12   :  { %2355 = vmatpush3.bf16.msra.mxu0 %v2810_v49  ;;  %2358 = vmatprep.mubr.msk.bf16.mxu0 %vm2671_vm0, %v2670_v1 }
 0xd13   :  { %2356 = vmatprep.subr.bf16.mxu0 %v2670_v1 }
 0xd16   :  { %2357 = vmatpush3.bf16.msra.mxu0 %v2819_v53 }
 0xd17   :  { %2370 = vmatprep.subr.bf16.mxu0 %v2670_v1 }
 0xd64   :  { %v1072_v3 = vpop.permute.xlu1 %1071 }
 0xd65   :  { %2335 = vmatmul.mubr.msk.bf16.vlgmr.msra.gmra.mxu1 %vm158_vm2, %v1072_v3 }
 0xd66   :  { %2347 = vmatpush3.bf16.msra.mxu1 %v2805_v48  ;;  %2350 = vmatprep.mubr.msk.bf16.mxu1 %vm2671_vm0, %v2670_v1 }
 0xd67   :  { %2348 = vmatprep.subr.bf16.mxu1 %v2670_v1 }
 0xd6a   :  { %2349 = vmatpush3.bf16.msra.mxu1 %v2814_v52 }
 0xd6b   :  { %2362 = vmatprep.subr.bf16.mxu1 %v2670_v1 }
 0xdc9   :  { %v1063_v4 = vpop.f32.mrf.mxu0 }
 0xdca   :  { %v1064_v13 = vadd.f32 %v2874_v40, %v1063_v4 }
 0xdcb   :  { %v2328_v37 = vpop.f32.mrf.mxu0 }
 0xdcd   :  { %v1066_v39 = vpop.f32.mrf.mxu0 }
 0xdcf   :  { %v2329_v41 = vpop.f32.mrf.mxu0 }
 0xdd1   :  { %v1178_v42 = vpop.f32.mrf.mxu0 }
 0xdd2   :  { %v1199_v43 = vadd.f32 %v1178_v42, %v2787_v8  ;;  %v1185_v51 = vrot.slane %v1178_v42, 4  ;;  %v1186_v56 = vrot.slane %v1178_v42, 5 }
 0xdd3   :  { %v2344_v44 = vpop.f32.mrf.mxu0 }
 0xdd4   :  { %v1201_v14 = vrot.slane %v1199_v43, 4  ;;  %v1202_v16 = vrot.slane %v1199_v43, 5  ;;  %v1189_v60 = vadd.f32 %v1185_v51, %v2794_v23  ;;  %v1190_v30 = vadd.f32 %v1186_v56, %v2792_v21 }
 0xdd5   :  { %v1181_v48 = vpop.f32.mrf.mxu0 }
 0xdd6   :  { %1203 = vrot.lane.b32.xlu0 %v1201_v14, %s2665_s27  ;;  %1205 = vrot.lane.b32.xlu1 %v1202_v16, %s2665_s27  ;;  %v1191_v62 = vmul.f32 0.5, %v1189_v60  ;;  %v1192_v63 = vmul.f32 0.5, %v1190_v30 }
 0xdd7   :  { %v2345_v45 = vpop.f32.mrf.mxu0 }
 0xdd8   :  { %2498 = vtanh.f32 %v1191_v62 }
 0xdd9   :  { %2500 = vtanh.f32 %v1192_v63 }
 0xde5   :  { %v2499_v2 = vpop.eup %2498 }
 0xde6   :  { %v2501_v5 = vpop.eup %2500  ;;  %v1195_v6 = vmul.f32 0.5, %v2499_v2 }
 0xde7   :  { %v1196_v7 = vmul.f32 0.5, %v2501_v5  ;;  %v3081_v5 = vld [vmem:[%s3282_s3 + $0x8] sm:$0xff]  }
 0xde8   :  { %v1197_v9 = vadd.f32 0.5, %v1195_v6  ;;  %v3090_v6 = vld [vmem:[%s3282_s3] sm:$0xff]  }
 0xde9   :  { %v1198_v10 = vadd.f32 0.5, %v1196_v7 }
 0xe25   :  { %v1110_v50 = vpop.f32.mrf.mxu1 }
 0xe26   :  { %v1121_v54 = vadd.f32 %v1110_v50, %v2870_v38  ;;  %v1116_v15 = vadd.f32 %v1110_v50, %v1064_v13 }
 0xe27   :  { %v2336_v57 = vpop.f32.mrf.mxu1 }
 0xe28   :  { %1123 = vrot.lane.b32.xlu0 %v1121_v54, %s2665_s27  ;;  %v1117_v17 = vmul.f32 0.5, %v1116_v15 }
 0xe29   :  { %v1113_v58 = vpop.f32.mrf.mxu1 }
 0xe2a   :  { %2502 = vtanh.f32 %v1117_v17 }
 0xe2b   :  { %v2337_v61 = vpop.f32.mrf.mxu1 }
 0xe37   :  { %v2503_v46 = vpop.eup %2502 }
 0xe38   :  { %v1119_v47 = vmul.f32 0.5, %v2503_v46 }
 0xe3a   :  { %v1120_v18 = vadd.f32 0.5, %v1119_v47 }
 0xe48   :  { %v1204_v55 = vpop.permute.xlu0 %1203  ;;  %v1206_v59 = vpop.permute.xlu1 %1205 }
 0xe49   :  { %v1209_v11 = vmul.f32 %v1204_v55, %v1197_v9  ;;  %v1210_v12 = vmul.f32 %v1206_v59, %v1198_v10 }
 0xe4b   :  { %1213 = vrot.lane.b32.xlu1 %v1209_v11, %s2665_s27  ;;  %1215 = vrot.lane.b32.xlu0 %v1210_v12, %s2665_s27 }
 0xe9a   :  { %v1124_v19 = vpop.permute.xlu0 %1123 }
 0xe9b   :  { %v1126_v22 = vmul.f32 %v1124_v19, %v1120_v18 }
 0xe9d   :  { %1128 = vrot.lane.b32.xlu1 %v1126_v22, %s2665_s27 }
 0xebd   :  { %v1214_v0 = vpop.permute.xlu1 %1213  ;;  %v1216_v25 = vpop.permute.xlu0 %1215 }
 0xebe   :  { %v1219_v26 = vadd.f32 %v1214_v0, %v2794_v23  ;;  %v1220_v27 = vadd.f32 %v1216_v25, %v2792_v21 }
 0xec0   :  { %2504 = vtanh.f32 %v1219_v26 }
 0xec1   :  { %2506 = vtanh.f32 %v1220_v27 }
 0xecd   :  { %v2505_v28 = vpop.eup %2504 }
 0xece   :  { %v2507_v29 = vpop.eup %2506  ;;  %v1225_v31 = vrot.slane %v2505_v28, 1 }
 0xecf   :  { %v1226_v32 = vrot.slane %v2507_v29, 1 }
 0xed0   :  { %v1229_v33 = vsub.f32 %v3006_v24, %v1225_v31 }
 0xed1   :  { %v1230_v35 = vsub.f32 %v3004_v20, %v1226_v32 }
 0xed2   :  { %v1233_v36 = vrot.slane %v1229_v33, 7 }
 0xed3   :  { %v1234_v3 = vrot.slane %v1230_v35, 7 }
 0xed4   :  { %1235 = vrot.lane.b32.xlu0 %v1233_v36, %s2673_s0 }
 0xed5   :  { %1237 = vrot.lane.b32.xlu1 %v1234_v3, %s2673_s0 }
 0xf0f   :  { %v1129_v4 = vpop.permute.xlu1 %1128 }
 0xf10   :  { %v1131_v37 = vadd.f32 %v1129_v4, %v1064_v13 }
 0xf12   :  { %2508 = vtanh.f32 %v1131_v37 }
 0xf1f   :  { %v2509_v39 = vpop.eup %2508 }
 0xf20   :  { %v1133_v41 = vsub.f32 %v3014_v34, %v2509_v39 }
 0xf22   :  { %1135 = vrot.lane.b32.xlu0 %v1133_v41, %s2673_s0 }
 0xf46   :  { %v1236_v42 = vpop.permute.xlu0 %1235 }
 0xf47   :  { %v1241_v43 = vmul.f32 %v1236_v42, %v1197_v9  ;;  %v1238_v44 = vpop.permute.xlu1 %1237  ;;  %v3102_v9 = vld [vmem:[#allocation8 + $0x8] sm:$0xff]  }
 0xf48   :  { %v1242_v24 = vmul.f32 %v1238_v44, %v1198_v10 }
 0xf49   :  { %1245 = vrot.lane.b32.xlu1 %v1241_v43, %s2674_s14 }
 0xf4a   :  { %1247 = vrot.lane.b32.xlu0 %v1242_v24, %s2674_s14 }
 0xf94   :  { %v1136_v20 = vpop.permute.xlu0 %1135 }
 0xf95   :  { %v1138_v14 = vmul.f32 %v1136_v20, %v1120_v18 }
 0xf97   :  { %1140 = vrot.lane.b32.xlu1 %v1138_v14, %s2674_s14 }
 0xfbb   :  { %v1246_v16 = vpop.permute.xlu1 %1245 }
 0xfbc   :  { %v1248_v48 = vpop.permute.xlu0 %1247  ;;  %v3062_v45 = vadd.f32 %v2505_v28, %v1246_v16 }
 0xfbd   :  { %v3064_v50 = vadd.f32 %v2507_v29, %v1248_v48 }
 0xfbe   :  { %v1253_v34 = vpack.c.bf16 %v3062_v45, %v3062_v45 }
 0xfbf   :  { %v1254_v51 = vpack.c.bf16 %v3064_v50, %v3064_v50 }
 0xfc0   :  { %v1257_v54 = vunpack.c.l.b16 %v1253_v34 }
 0xfc1   :  { %v1258_v56 = vunpack.c.l.b16 %v1254_v51 }
 0xfc2   :  { %v1259_v57 = vrot.slane %v1257_v54, 4 }
 0xfc3   :  { %v1260_v58 = vrot.slane %v1258_v56, 3 }
 0xfc5   :  { %v1261_v60 = vsel %vm282_vm1, %v1260_v58, %v1259_v57 }
 0xfc6   :  { %v1262_v30 = vpack.c.b16 %v1261_v60, %v1261_v60 }
 0xfc8   :  { %1263 = vrot.lane.b32.xlu0 %v1262_v30, %s2665_s27 }
0x1009   :  { %v1141_v61 = vpop.permute.xlu1 %1140 }
0x100a   :  { %v3072_v62 = vadd.f32 %v2509_v39, %v1141_v61 }
0x100c   :  { %v1308_v63 = vpack.c.bf16 %v3072_v62, %v3072_v62 }
0x100e   :  { %1310 = vrot.lane.b32.xlu1 %v1308_v63, %s2665_s27 }
0x103a   :  { %v1264_v2 = vpop.permute.xlu0 %1263 }
0x103b   :  { %2351 = vmatmul.mubr.msk.bf16.vlgmr.msra.gmra.mxu1 %vm158_vm2, %v1264_v2 }
0x103c   :  { %2363 = vmatpush3.bf16.msra.mxu1 %v3081_v5  ;;  %2366 = vmatprep.mubr.msk.bf16.mxu1 %vm2671_vm0, %v2670_v1 }
0x103d   :  { %2364 = vmatprep.subr.bf16.mxu1 %v2670_v1 }
0x1040   :  { %2365 = vmatpush3.bf16.msra.mxu1 %v3090_v6 }
0x1041   :  { %2378 = vmatprep.subr.bf16.mxu1 %v2670_v1 }
0x1043   :  { %2367 = vmatmul.mubr.msk.bf16.vlgmr.msra.gmra.mxu1 %vm158_vm2, %v1264_v2 }
0x1044   :  { %2379 = vmatpush3.bf16.msra.mxu1 %v2810_v49  ;;  %2382 = vmatprep.mubr.msk.bf16.mxu1 %vm2671_vm0, %v2670_v1 }
0x1045   :  { %2380 = vmatprep.subr.bf16.mxu1 %v2670_v1 }
0x1048   :  { %2381 = vmatpush3.bf16.msra.mxu1 %v2819_v53 }
0x1049   :  { %2394 = vmatprep.subr.bf16.mxu1 %v2670_v1 }
0x1080   :  { %v1311_v7 = vpop.permute.xlu1 %1310 }
0x1081   :  { %2359 = vmatmul.mubr.msk.bf16.vlgmr.msra.gmra.mxu0 %vm158_vm2, %v1311_v7 }
0x1082   :  { %2371 = vmatpush3.bf16.msra.mxu0 %v3102_v9  ;;  %2374 = vmatprep.mubr.msk.bf16.mxu0 %vm2671_vm0, %v2670_v1 }
0x1083   :  { %2372 = vmatprep.subr.bf16.mxu0 %v2670_v1 }
0x1086   :  { %2373 = vmatpush3.bf16.msra.mxu0 %v2814_v52 }
0x1087   :  { %2386 = vmatprep.subr.bf16.mxu0 %v2670_v1 }
0x10fb   :  { %v1302_v49 = vpop.f32.mrf.mxu1 }
0x10fc   :  { %v1303_v42 = vadd.f32 %v2874_v40, %v1302_v49 }
0x10fd   :  { %v2352_v53 = vpop.f32.mrf.mxu1 }
0x10ff   :  { %v1305_v10 = vpop.f32.mrf.mxu1 }
0x1101   :  { %v2353_v55 = vpop.f32.mrf.mxu1 }
0x1103   :  { %v1417_v59 = vpop.f32.mrf.mxu1 }
0x1104   :  { %v1438_v11 = vadd.f32 %v1417_v59, %v2787_v8  ;;  %v1425_v0 = vrot.slane %v1417_v59, 4  ;;  %v1424_v25 = vrot.slane %v1417_v59, 3 }
0x1105   :  { %v2368_v12 = vpop.f32.mrf.mxu1 }
0x1106   :  { %v1441_v13 = vrot.slane %v1438_v11, 4  ;;  %v1440_v15 = vrot.slane %v1438_v11, 3  ;;  %v1429_v26 = vadd.f32 %v1425_v0, %v2792_v21  ;;  %v1428_v27 = vadd.f32 %v1424_v25, %v2794_v23 }
0x1107   :  { %v1420_v17 = vpop.f32.mrf.mxu1 }
0x1108   :  { %1444 = vrot.lane.b32.xlu1 %v1441_v13, %s2665_s27  ;;  %1442 = vrot.lane.b32.xlu0 %v1440_v15, %s2665_s27  ;;  %v1431_v28 = vmul.f32 0.5, %v1429_v26  ;;  %v1430_v29 = vmul.f32 0.5, %v1428_v27 }
0x1109   :  { %v2369_v46 = vpop.f32.mrf.mxu1 }
0x110a   :  { %2510 = vtanh.f32 %v1431_v28 }
0x110b   :  { %2512 = vtanh.f32 %v1430_v29 }
0x1117   :  { %v2511_v31 = vpop.eup %2510 }
0x1118   :  { %v2513_v32 = vpop.eup %2512  ;;  %v1435_v33 = vmul.f32 0.5, %v2511_v31  ;;  %v3158_v31 = vld [vmem:[%s3286_s7 + $0x8] sm:$0xff]  }
0x1119   :  { %v1434_v35 = vmul.f32 0.5, %v2513_v32  ;;  %v3167_v32 = vld [vmem:[%s3286_s7] sm:$0xff]  }
0x111a   :  { %v1437_v36 = vadd.f32 0.5, %v1435_v33 }
0x111b   :  { %v1436_v3 = vadd.f32 0.5, %v1434_v35  ;;  %v3176_v35 = vld [vmem:[#allocation8] sm:$0xff]  }
0x1141   :  { %v1349_v47 = vpop.f32.mrf.mxu0 }
0x1142   :  { %v1360_v52 = vadd.f32 %v1349_v47, %v2870_v38  ;;  %v1355_v43 = vadd.f32 %v1349_v47, %v1303_v42 }
0x1143   :  { %v2360_v18 = vpop.f32.mrf.mxu0 }
0x1144   :  { %1362 = vrot.lane.b32.xlu0 %v1360_v52, %s2665_s27  ;;  %v1356_v44 = vmul.f32 0.5, %v1355_v43 }
0x1145   :  { %v1352_v19 = vpop.f32.mrf.mxu0 }
0x1146   :  { %2514 = vtanh.f32 %v1356_v44 }
0x1147   :  { %v2361_v22 = vpop.f32.mrf.mxu0 }
0x1153   :  { %v2515_v24 = vpop.eup %2514 }
0x1154   :  { %v1358_v20 = vmul.f32 0.5, %v2515_v24 }
0x1156   :  { %v1359_v14 = vadd.f32 0.5, %v1358_v20 }
0x117a   :  { %v1445_v4 = vpop.permute.xlu1 %1444  ;;  %v1443_v37 = vpop.permute.xlu0 %1442 }
0x117b   :  { %v1449_v39 = vmul.f32 %v1445_v4, %v1437_v36  ;;  %v1448_v41 = vmul.f32 %v1443_v37, %v1436_v3 }
0x117d   :  { %1454 = vrot.lane.b32.xlu0 %v1449_v39, %s2665_s27  ;;  %1452 = vrot.lane.b32.xlu1 %v1448_v41, %s2665_s27 }
0x11b6   :  { %v1363_v16 = vpop.permute.xlu0 %1362 }
0x11b7   :  { %v1365_v48 = vmul.f32 %v1363_v16, %v1359_v14 }
0x11b9   :  { %1367 = vrot.lane.b32.xlu1 %v1365_v48, %s2665_s27 }
0x11ef   :  { %v1455_v34 = vpop.permute.xlu0 %1454  ;;  %v1453_v51 = vpop.permute.xlu1 %1452 }
0x11f0   :  { %v1459_v54 = vadd.f32 %v1455_v34, %v2792_v21  ;;  %v1458_v56 = vadd.f32 %v1453_v51, %v2794_v23 }
0x11f2   :  { %2516 = vtanh.f32 %v1459_v54 }
0x11f3   :  { %2518 = vtanh.f32 %v1458_v56 }
0x11ff   :  { %v2517_v57 = vpop.eup %2516 }
0x1200   :  { %v2519_v40 = vpop.eup %2518  ;;  %v1465_v58 = vrot.slane %v2517_v57, 1 }
0x1201   :  { %v1464_v60 = vrot.slane %v2519_v40, 1 }
0x1202   :  { %v1469_v30 = vsub.f32 %v3064_v50, %v1465_v58 }
0x1203   :  { %v1468_v61 = vsub.f32 %v3062_v45, %v1464_v60 }
0x1204   :  { %v1473_v63 = vrot.slane %v1469_v30, 7 }
0x1205   :  { %v1472_v2 = vrot.slane %v1468_v61, 7 }
0x1206   :  { %1476 = vrot.lane.b32.xlu1 %v1473_v63, %s2673_s0  ;;  %v3187_v63 = vld [vmem:[#allocation10] ss:$0 sm:$0xff] }
0x1207   :  { %1474 = vrot.lane.b32.xlu0 %v1472_v2, %s2673_s0 }
0x122b   :  { %v1368_v7 = vpop.permute.xlu1 %1367 }
0x122c   :  { %v1370_v49 = vadd.f32 %v1368_v7, %v1303_v42 }
0x122e   :  { %2520 = vtanh.f32 %v1370_v49 }
0x123b   :  { %v2521_v53 = vpop.eup %2520 }
0x123c   :  { %v1372_v10 = vsub.f32 %v3072_v62, %v2521_v53 }
0x123e   :  { %1374 = vrot.lane.b32.xlu0 %v1372_v10, %s2673_s0 }
0x1278   :  { %v1477_v55 = vpop.permute.xlu1 %1476 }
0x1279   :  { %v1475_v59 = vpop.permute.xlu0 %1474  ;;  %v1481_v11 = vmul.f32 %v1477_v55, %v1437_v36 }
0x127a   :  { %v1480_v50 = vmul.f32 %v1475_v59, %v1436_v3 }
0x127b   :  { %1486 = vrot.lane.b32.xlu0 %v1481_v11, %s2674_s14 }
0x127c   :  { %1484 = vrot.lane.b32.xlu1 %v1480_v50, %s2674_s14 }
0x12b0   :  { %v1375_v45 = vpop.permute.xlu0 %1374 }
0x12b1   :  { %v1377_v12 = vmul.f32 %v1375_v45, %v1359_v14 }
0x12b3   :  { %1379 = vrot.lane.b32.xlu1 %v1377_v12, %s2674_s14 }
0x12ed   :  { %v1487_v13 = vpop.permute.xlu0 %1486 }
0x12ee   :  { %v3132_v15 = vadd.f32 %v2517_v57, %v1487_v13  ;;  %v1485_v17 = vpop.permute.xlu1 %1484 }
0x12ef   :  { %v3134_v46 = vadd.f32 %v2519_v40, %v1485_v17 }
0x12f0   :  { %v1493_v62 = vpack.c.bf16 %v3132_v15, %v3132_v15 }
0x12f1   :  { %v1492_v47 = vpack.c.bf16 %v3134_v46, %v3134_v46 }
0x12f2   :  { %v1497_v52 = vunpack.c.l.b16 %v1493_v62 }
0x12f3   :  { %v1496_v18 = vunpack.c.l.b16 %v1492_v47 }
0x12f4   :  { %v1499_v19 = vrot.slane %v1497_v52, 4 }
0x12f5   :  { %v1498_v22 = vrot.slane %v1496_v18, 5 }
0x12f7   :  { %v1500_v0 = vsel %vm282_vm1, %v1499_v19, %v1498_v22 }
0x12f8   :  { %v1501_v25 = vpack.c.b16 %v1500_v0, %v1500_v0 }
0x12fa   :  { %1502 = vrot.lane.b32.xlu0 %v1501_v25, %s2665_s27 }
0x1325   :  { %v1380_v26 = vpop.permute.xlu1 %1379 }
0x1326   :  { %v3142_v27 = vadd.f32 %v2521_v53, %v1380_v26 }
0x1328   :  { %v1547_v28 = vpack.c.bf16 %v3142_v27, %v3142_v27 }
0x132a   :  { %1549 = vrot.lane.b32.xlu1 %v1547_v28, %s2665_s27 }
0x136c   :  { %v1503_v29 = vpop.permute.xlu0 %1502 }
0x136d   :  { %2375 = vmatmul.mubr.msk.bf16.vlgmr.msra.gmra.mxu0 %vm158_vm2, %v1503_v29 }
0x136e   :  { %2387 = vmatpush3.bf16.msra.mxu0 %v3081_v5  ;;  %2390 = vmatprep.mubr.msk.bf16.mxu0 %vm2671_vm0, %v2670_v1 }
0x136f   :  { %2388 = vmatprep.subr.bf16.mxu0 %v2670_v1 }
0x1372   :  { %2389 = vmatpush3.bf16.msra.mxu0 %v3090_v6 }
0x1373   :  { %2402 = vmatprep.subr.bf16.mxu0 %v2670_v1 }
0x1375   :  { %2391 = vmatmul.mubr.msk.bf16.vlgmr.msra.gmra.mxu0 %vm158_vm2, %v1503_v29 }
0x1376   :  { %2403 = vmatpush3.bf16.msra.mxu0 %v3158_v31  ;;  %2406 = vmatprep.mubr.msk.bf16.mxu0 %vm2671_vm0, %v2670_v1 }
0x1377   :  { %2404 = vmatprep.subr.bf16.mxu0 %v2670_v1 }
0x137a   :  { %2405 = vmatpush3.bf16.msra.mxu0 %v3167_v32 }
0x137b   :  { %2418 = vmatprep.subr.bf16.mxu0 %v2670_v1 }
0x139c   :  { %v1550_v33 = vpop.permute.xlu1 %1549 }
0x139d   :  { %2383 = vmatmul.mubr.msk.bf16.vlgmr.msra.gmra.mxu1 %vm158_vm2, %v1550_v33 }
0x139e   :  { %2395 = vmatpush3.bf16.msra.mxu1 %v3102_v9  ;;  %2398 = vmatprep.mubr.msk.bf16.mxu1 %vm2671_vm0, %v2670_v1 }
0x139f   :  { %2396 = vmatprep.subr.bf16.mxu1 %v2670_v1 }
0x13a2   :  { %2397 = vmatpush3.bf16.msra.mxu1 %v3176_v35 }
0x13a3   :  { %2410 = vmatprep.subr.bf16.mxu1 %v2670_v1 }
0x142d   :  { %v1541_v36 = vpop.f32.mrf.mxu0 }
0x142e   :  { %v1542_v2 = vadd.f32 %v3187_v63, %v1541_v36 }
0x142f   :  { %v2376_v3 = vpop.f32.mrf.mxu0 }
0x1431   :  { %v1544_v4 = vpop.f32.mrf.mxu0 }
0x1433   :  { %v2377_v37 = vpop.f32.mrf.mxu0 }
0x1435   :  { %v1656_v39 = vpop.f32.mrf.mxu0 }
0x1436   :  { %v1677_v41 = vadd.f32 %v1656_v39, %v2787_v8  ;;  %v1663_v54 = vrot.slane %v1656_v39, 2  ;;  %v1664_v7 = vrot.slane %v1656_v39, 3 }
0x1437   :  { %v2392_v42 = vpop.f32.mrf.mxu0 }
0x1438   :  { %v1679_v43 = vrot.slane %v1677_v41, 2  ;;  %v1680_v34 = vrot.slane %v1677_v41, 3  ;;  %v1667_v56 = vadd.f32 %v1663_v54, %v2794_v23  ;;  %v1668_v53 = vadd.f32 %v1664_v7, %v2792_v21 }
0x1439   :  { %v1659_v44 = vpop.f32.mrf.mxu0 }
0x143a   :  { %1681 = vrot.lane.b32.xlu1 %v1679_v43, %s2665_s27  ;;  %v1669_v57 = vmul.f32 0.5, %v1667_v56  ;;  %v1670_v55 = vmul.f32 0.5, %v1668_v53 }
0x143b   :  { %v2393_v24 = vpop.f32.mrf.mxu0 }
0x143c   :  { %2522 = vtanh.f32 %v1669_v57 }
0x1449   :  { %v2523_v40 = vpop.eup %2522 }
0x144a   :  { %v1673_v58 = vmul.f32 0.5, %v2523_v40 }
0x144c   :  { %v1675_v60 = vadd.f32 0.5, %v1673_v58 }
0x145d   :  { %v1588_v20 = vpop.f32.mrf.mxu1 }
0x145e   :  { %v1599_v14 = vadd.f32 %v1588_v20, %v2870_v38  ;;  %v1594_v49 = vadd.f32 %v1588_v20, %v1542_v2 }
0x145f   :  { %v2384_v16 = vpop.f32.mrf.mxu1 }
0x1460   :  { %1601 = vrot.lane.b32.xlu0 %v1599_v14, %s2665_s27  ;;  %v1595_v10 = vmul.f32 0.5, %v1594_v49 }
0x1461   :  { %v1591_v48 = vpop.f32.mrf.mxu1 }
0x1462   :  { %2524 = vtanh.f32 %v1595_v10 }
0x1463   :  { %v2385_v51 = vpop.f32.mrf.mxu1  ;;  %2526 = vtanh.f32 %v1670_v55 }
0x1464   :  { %1683 = vrot.lane.b32.xlu0 %v1680_v34, %s2665_s27 }
0x146f   :  { %v2525_v59 = vpop.eup %2524 }
0x1470   :  { %v1597_v11 = vmul.f32 0.5, %v2525_v59  ;;  %v2527_v50 = vpop.eup %2526 }
0x1471   :  { %v1674_v12 = vmul.f32 0.5, %v2527_v50 }
0x1472   :  { %v1598_v45 = vadd.f32 0.5, %v1597_v11 }
0x1473   :  { %v1676_v62 = vadd.f32 0.5, %v1674_v12 }
0x14ac   :  { %v1682_v30 = vpop.permute.xlu1 %1681 }
0x14ad   :  { %v1687_v61 = vmul.f32 %v1682_v30, %v1675_v60 }
0x14af   :  { %1691 = vrot.lane.b32.xlu0 %v1687_v61, %s2665_s27 }
0x14d2   :  { %v1602_v13 = vpop.permute.xlu0 %1601 }
0x14d3   :  { %v1604_v17 = vmul.f32 %v1602_v13, %v1598_v45 }
0x14d5   :  { %1606 = vrot.lane.b32.xlu1 %v1604_v17, %s2665_s27 }
0x14d6   :  { %v1684_v47 = vpop.permute.xlu0 %1683 }
0x14d7   :  { %v1688_v52 = vmul.f32 %v1684_v47, %v1676_v62 }
0x14d9   :  { %1693 = vrot.lane.b32.xlu1 %v1688_v52, %s2665_s27 }
0x1521   :  { %v1692_v18 = vpop.permute.xlu0 %1691 }
0x1522   :  { %v1697_v19 = vadd.f32 %v1692_v18, %v2794_v23 }
0x1524   :  { %2528 = vtanh.f32 %v1697_v19 }
0x1531   :  { %v2529_v22 = vpop.eup %2528 }
0x1532   :  { %v1703_v0 = vrot.slane %v2529_v22, 1 }
0x1534   :  { %v1707_v25 = vsub.f32 %v3134_v46, %v1703_v0 }
0x1536   :  { %v1711_v26 = vrot.slane %v1707_v25, 7 }
0x1538   :  { %1713 = vrot.lane.b32.xlu1 %v1711_v26, %s2673_s0 }
0x1547   :  { %v1607_v28 = vpop.permute.xlu1 %1606 }
0x1548   :  { %v1609_v29 = vadd.f32 %v1607_v28, %v1542_v2 }
0x154a   :  { %2530 = vtanh.f32 %v1609_v29 }
0x154b   :  { %v1694_v33 = vpop.permute.xlu1 %1693 }
0x154c   :  { %v1698_v36 = vadd.f32 %v1694_v33, %v2792_v21 }
0x154e   :  { %2532 = vtanh.f32 %v1698_v36 }
0x1557   :  { %v2531_v3 = vpop.eup %2530 }
0x1558   :  { %v1611_v4 = vsub.f32 %v3142_v27, %v2531_v3 }
0x155a   :  { %1613 = vrot.lane.b32.xlu0 %v1611_v4, %s2673_s0 }
0x155b   :  { %v2533_v37 = vpop.eup %2532 }
0x155c   :  { %v1704_v39 = vrot.slane %v2533_v37, 1 }
0x155e   :  { %v1708_v41 = vsub.f32 %v3132_v15, %v1704_v39 }
0x1560   :  { %v1712_v46 = vrot.slane %v1708_v41, 7 }
0x1562   :  { %1715 = vrot.lane.b32.xlu0 %v1712_v46, %s2673_s0 }
0x15aa   :  { %v1714_v42 = vpop.permute.xlu1 %1713 }
0x15ab   :  { %v1719_v43 = vmul.f32 %v1714_v42, %v1675_v60 }
0x15ad   :  { %1723 = vrot.lane.b32.xlu0 %v1719_v43, %s2674_s14 }
0x15cc   :  { %v1614_v44 = vpop.permute.xlu0 %1613 }
0x15cd   :  { %v1616_v24 = vmul.f32 %v1614_v44, %v1598_v45 }
0x15cf   :  { %1618 = vrot.lane.b32.xlu1 %v1616_v24, %s2674_s14 }
0x15d4   :  { %v1716_v20 = vpop.permute.xlu0 %1715 }
0x15d5   :  { %v1720_v14 = vmul.f32 %v1716_v20, %v1676_v62 }
0x15d7   :  { %1725 = vrot.lane.b32.xlu1 %v1720_v14, %s2674_s14 }
0x161f   :  { %v1724_v27 = vpop.permute.xlu0 %1723 }
0x1620   :  { %v3206_v15 = vadd.f32 %v2529_v22, %v1724_v27 }
0x1622   :  { %v1731_v51 = vpack.c.bf16 %v3206_v15, %v3206_v15 }
0x1624   :  { %v1735_v57 = vunpack.c.l.b16 %v1731_v51 }
0x1626   :  { %v1737_v60 = vrot.slane %v1735_v57, 6 }
0x1641   :  { %v1619_v16 = vpop.permute.xlu1 %1618 }
0x1642   :  { %v3204_v48 = vadd.f32 %v2531_v3, %v1619_v16 }
0x1644   :  { %v1786_v34 = vpack.c.bf16 %v3204_v48, %v3204_v48 }
0x1646   :  { %1788 = vrot.lane.b32.xlu0 %v1786_v34, %s2665_s27 }
0x1649   :  { %v1726_v54 = vpop.permute.xlu1 %1725 }
0x164a   :  { %v3213_v56 = vadd.f32 %v2533_v37, %v1726_v54 }
0x164c   :  { %v1732_v40 = vpack.c.bf16 %v3213_v56, %v3213_v56 }
0x164e   :  { %v1736_v58 = vunpack.c.l.b16 %v1732_v40 }
0x1650   :  { %v1738_v30 = vrot.slane %v1736_v58, 5 }
0x1652   :  { %v1739_v61 = vsel %vm282_vm1, %v1738_v30, %v1737_v60 }
0x1653   :  { %v1740_v2 = vpack.c.b16 %v1739_v61, %v1739_v61 }
0x1655   :  { %1741 = vrot.lane.b32.xlu1 %v1740_v2, %s2665_s27 }
0x16b8   :  { %v1789_v7 = vpop.permute.xlu0 %1788 }
0x16b9   :  { %2407 = vmatmul.mubr.msk.bf16.vlgmr.msra.gmra.mxu0 %vm158_vm2, %v1789_v7 }
0x16ba   :  { %2419 = vmatpush3.bf16.msra.mxu0 %v3102_v9  ;;  %2422 = vmatprep.mubr.msk.bf16.mxu0 %vm2671_vm0, %v2670_v1 }
0x16bb   :  { %2420 = vmatprep.subr.bf16.mxu0 %v2670_v1 }
0x16be   :  { %2421 = vmatpush3.bf16.msra.mxu0 %v3176_v35 }
0x16c7   :  { %v1742_v49 = vpop.permute.xlu1 %1741 }
0x16c8   :  { %2399 = vmatmul.mubr.msk.bf16.vlgmr.msra.gmra.mxu1 %vm158_vm2, %v1742_v49 }
0x16c9   :  { %2411 = vmatpush3.bf16.msra.mxu1 %v3081_v5  ;;  %2414 = vmatprep.mubr.msk.bf16.mxu1 %vm2671_vm0, %v2670_v1 }
0x16ca   :  { %2412 = vmatprep.subr.bf16.mxu1 %v2670_v1 }
0x16cd   :  { %2413 = vmatpush3.bf16.msra.mxu1 %v3090_v6 }
0x16ce   :  { %2426 = vmatprep.subr.bf16.mxu1 %v2670_v1 }
0x16d0   :  { %2415 = vmatmul.mubr.msk.bf16.vlgmr.msra.gmra.mxu1 %vm158_vm2, %v1742_v49 }
0x16d1   :  { %2427 = vmatpush3.bf16.msra.mxu1 %v3158_v31  ;;  %2430 = vmatprep.mubr.msk.bf16.mxu1 %vm2671_vm0, %v2670_v1 }
0x16d2   :  { %2428 = vmatprep.subr.bf16.mxu1 %v2670_v1 }
0x16d5   :  { %2429 = vmatpush3.bf16.msra.mxu1 %v3167_v32 }
0x1779   :  { %v1827_v5 = vpop.f32.mrf.mxu0 }
0x177a   :  { %v1838_v9 = vadd.f32 %v1827_v5, %v2870_v38 }
0x177b   :  { %v2408_v35 = vpop.f32.mrf.mxu0 }
0x177c   :  { %1840 = vrot.lane.b32.xlu0 %v1838_v9, %s2665_s27 }
0x177d   :  { %v1830_v6 = vpop.f32.mrf.mxu0 }
0x177f   :  { %v2409_v53 = vpop.f32.mrf.mxu0 }
0x1788   :  { %v1780_v10 = vpop.f32.mrf.mxu1 }
0x1789   :  { %v1781_v17 = vadd.f32 %v3187_v63, %v1780_v10 }
0x178a   :  { %v2400_v55 = vpop.f32.mrf.mxu1 }
0x178b   :  { %v1833_v62 = vadd.f32 %v1827_v5, %v1781_v17 }
0x178c   :  { %v1783_v59 = vpop.f32.mrf.mxu1 }
0x178d   :  { %v1834_v47 = vmul.f32 0.5, %v1833_v62 }
0x178e   :  { %v2401_v11 = vpop.f32.mrf.mxu1 }
0x178f   :  { %2534 = vtanh.f32 %v1834_v47 }
0x1790   :  { %v1895_v31 = vpop.f32.mrf.mxu1 }
0x1791   :  { %v1916_v50 = vadd.f32 %v1895_v31, %v2787_v8  ;;  %v1903_v52 = vrot.slane %v1895_v31, 2  ;;  %v1902_v19 = vrot.slane %v1895_v31, 1 }
0x1792   :  { %v2416_v45 = vpop.f32.mrf.mxu1 }
0x1793   :  { %v1919_v12 = vrot.slane %v1916_v50, 2  ;;  %v1918_v1 = vrot.slane %v1916_v50, 1  ;;  %v1907_v22 = vadd.f32 %v1903_v52, %v2792_v21  ;;  %v1906_v0 = vadd.f32 %v1902_v19, %v2794_v23 }
0x1794   :  { %v1898_v13 = vpop.f32.mrf.mxu1 }
0x1795   :  { %1922 = vrot.lane.b32.xlu0 %v1919_v12, %s2665_s27  ;;  %1920 = vrot.lane.b32.xlu1 %v1918_v1, %s2665_s27  ;;  %v1909_v25 = vmul.f32 0.5, %v1907_v22  ;;  %v1908_v28 = vmul.f32 0.5, %v1906_v0 }
0x1796   :  { %v2417_v32 = vpop.f32.mrf.mxu1 }
0x1797   :  { %2536 = vtanh.f32 %v1909_v25 }
0x1798   :  { %2538 = vtanh.f32 %v1908_v28 }
0x179c   :  { %v2535_v18 = vpop.eup %2534 }
0x179d   :  { %v1836_v8 = vmul.f32 0.5, %v2535_v18 }
0x179f   :  { %v1837_v26 = vadd.f32 0.5, %v1836_v8 }
0x17a4   :  { %v2537_v36 = vpop.eup %2536 }
0x17a5   :  { %v2539_v3 = vpop.eup %2538  ;;  %v1913_v4 = vmul.f32 0.5, %v2537_v36 }
0x17a6   :  { %v1912_v37 = vmul.f32 0.5, %v2539_v3 }
0x17a7   :  { %v1915_v39 = vadd.f32 0.5, %v1913_v4 }
0x17a8   :  { %v1914_v41 = vadd.f32 0.5, %v1912_v37 }
0x17ee   :  { %v1841_v29 = vpop.permute.xlu0 %1840 }
0x17ef   :  { %v1843_v33 = vmul.f32 %v1841_v29, %v1837_v26 }
0x17f1   :  { %1845 = vrot.lane.b32.xlu1 %v1843_v33, %s2665_s27 }
0x1807   :  { %v1923_v46 = vpop.permute.xlu0 %1922  ;;  %v1921_v42 = vpop.permute.xlu1 %1920 }
0x1808   :  { %v1927_v43 = vmul.f32 %v1923_v46, %v1915_v39  ;;  %v1926_v44 = vmul.f32 %v1921_v42, %v1914_v41 }
0x180a   :  { %1932 = vrot.lane.b32.xlu1 %v1927_v43, %s2665_s27  ;;  %1930 = vrot.lane.b32.xlu0 %v1926_v44, %s2665_s27 }
0x1863   :  { %v1846_v24 = vpop.permute.xlu1 %1845 }
0x1864   :  { %v1848_v20 = vadd.f32 %v1846_v24, %v1781_v17 }
0x1866   :  { %2540 = vtanh.f32 %v1848_v20 }
0x1873   :  { %v2541_v14 = vpop.eup %2540 }
0x1874   :  { %v1850_v27 = vsub.f32 %v3204_v48, %v2541_v14 }
0x1876   :  { %1852 = vrot.lane.b32.xlu0 %v1850_v27, %s2673_s0 }
0x187c   :  { %v1933_v16 = vpop.permute.xlu1 %1932  ;;  %v1931_v34 = vpop.permute.xlu0 %1930 }
0x187d   :  { %v1937_v51 = vadd.f32 %v1933_v16, %v2792_v21  ;;  %v1936_v54 = vadd.f32 %v1931_v34, %v2794_v23  ;;  %v2169_v34 = vld [vmem:[#allocation2] ss:$0 sm:$0xff] }
0x187f   :  { %2542 = vtanh.f32 %v1937_v51 }
0x1880   :  { %2544 = vtanh.f32 %v1936_v54 }
0x188c   :  { %v2543_v57 = vpop.eup %2542 }
0x188d   :  { %v2545_v40 = vpop.eup %2544  ;;  %v1943_v58 = vrot.slane %v2543_v57, 1 }
0x188e   :  { %v1942_v60 = vrot.slane %v2545_v40, 1 }
0x188f   :  { %v1947_v30 = vsub.f32 %v3213_v56, %v1943_v58 }
0x1890   :  { %v1946_v61 = vsub.f32 %v3206_v15, %v1942_v60 }
0x1891   :  { %v1951_v2 = vrot.slane %v1947_v30, 7 }
0x1892   :  { %v1950_v48 = vrot.slane %v1946_v61, 7 }
0x1893   :  { %1954 = vrot.lane.b32.xlu0 %v1951_v2, %s2673_s0 }
0x1894   :  { %1952 = vrot.lane.b32.xlu1 %v1950_v48, %s2673_s0 }
0x18e8   :  { %v1853_v7 = vpop.permute.xlu0 %1852 }
0x18e9   :  { %v1855_v21 = vmul.f32 %v1853_v7, %v1837_v26 }
0x18eb   :  { %1857 = vrot.lane.b32.xlu1 %v1855_v21, %s2674_s14 }
0x1905   :  { %v1955_v23 = vpop.permute.xlu0 %1954 }
0x1906   :  { %v1953_v49 = vpop.permute.xlu1 %1952  ;;  %v1959_v5 = vmul.f32 %v1955_v23, %v1915_v39 }
0x1907   :  { %v1958_v9 = vmul.f32 %v1953_v49, %v1914_v41 }
0x1908   :  { %1964 = vrot.lane.b32.xlu1 %v1959_v5, %s2674_s14 }
0x1909   :  { %1962 = vrot.lane.b32.xlu0 %v1958_v9, %s2674_s14 }
0x195d   :  { %v1858_v56 = vpop.permute.xlu1 %1857 }
0x195e   :  { %v1860_v15 = vadd.f32 %v2541_v14, %v1858_v56 }
0x1960   :  { %v2025_v35 = vpack.c.bf16 %v1860_v15, %v1860_v15 }
0x1962   :  { %2027 = vrot.lane.b32.xlu0 %v2025_v35, %s2665_s27 }
0x197a   :  { %v1965_v6 = vpop.permute.xlu1 %1964 }
0x197b   :  { %v1969_v53 = vadd.f32 %v2543_v57, %v1965_v6  ;;  %v1963_v10 = vpop.permute.xlu0 %1962 }
0x197c   :  { %v1968_v55 = vadd.f32 %v2545_v40, %v1963_v10 }
0x197d   :  { %v1971_v59 = vpack.c.bf16 %v1969_v53, %v1969_v53 }
0x197e   :  { %v1970_v11 = vpack.c.bf16 %v1968_v55, %v1968_v55 }
0x197f   :  { %v1975_v31 = vunpack.c.l.b16 %v1971_v59 }
0x1980   :  { %v1974_v50 = vunpack.c.l.b16 %v1970_v11 }
0x1981   :  { %v1977_v45 = vrot.slane %v1975_v31, 6 }
0x1982   :  { %v1976_v12 = vrot.slane %v1974_v50, 7 }
0x1984   :  { %v1978_v1 = vsel %vm282_vm1, %v1977_v45, %v1976_v12 }
0x1985   :  { %v1979_v13 = vpack.c.b16 %v1978_v1, %v1978_v1 }
0x1987   :  { %1980 = vrot.lane.b32.xlu1 %v1979_v13, %s2665_s27 }
0x19d4   :  { %v2028_v32 = vpop.permute.xlu0 %2027 }
0x19d5   :  { %2431 = vmatmul.mubr.msk.bf16.vlgmr.msra.gmra.mxu1 %vm158_vm2, %v2028_v32 }
0x19f9   :  { %v1981_v17 = vpop.permute.xlu1 %1980 }
0x19fa   :  { %2423 = vmatmul.mubr.msk.bf16.vlgmr.msra.gmra.mxu0 %vm158_vm2, %v1981_v17 }
0x1a95   :  { %v2066_v62 = vpop.f32.mrf.mxu1 }
0x1a96   :  { %v2077_v47 = vadd.f32 %v2066_v62, %v2870_v38 }
0x1a97   :  { %v2432_v52 = vpop.f32.mrf.mxu1 }
0x1a98   :  { %2079 = vrot.lane.b32.xlu0 %v2077_v47, %s2665_s27 }
0x1a99   :  { %v2069_v18 = vpop.f32.mrf.mxu1 }
0x1a9b   :  { %v2433_v19 = vpop.f32.mrf.mxu1 }
0x1aba   :  { %v2019_v22 = vpop.f32.mrf.mxu0 }
0x1abb   :  { %v2020_v26 = vadd.f32 %v3187_v63, %v2019_v22  ;;  %v2168_v63 = vld [vmem:[%s3288_s9] ss:$0 sm:$0xff] }
0x1abc   :  { %v2424_v8 = vpop.f32.mrf.mxu0 }
0x1abd   :  { %v2072_v28 = vadd.f32 %v2066_v62, %v2020_v26 }
0x1abe   :  { %v2022_v0 = vpop.f32.mrf.mxu0 }
0x1abf   :  { %v2073_v29 = vmul.f32 0.5, %v2072_v28 }
0x1ac0   :  { %v2425_v25 = vpop.f32.mrf.mxu0 }
0x1ac1   :  { %2546 = vtanh.f32 %v2073_v29 }
0x1ace   :  { %v2547_v33 = vpop.eup %2546 }
0x1acf   :  { %v2075_v36 = vmul.f32 0.5, %v2547_v33 }
0x1ad1   :  { %v2076_v3 = vadd.f32 0.5, %v2075_v36 }
0x1b0a   :  { %v2080_v4 = vpop.permute.xlu0 %2079 }
0x1b0b   :  { %v2082_v37 = vmul.f32 %v2080_v4, %v2076_v3 }
0x1b0d   :  { %2084 = vrot.lane.b32.xlu1 %v2082_v37, %s2665_s27 }
0x1b7f   :  { %v2085_v38 = vpop.permute.xlu1 %2084 }
0x1b80   :  { %v2087_v39 = vadd.f32 %v2085_v38, %v2020_v26 }
0x1b82   :  { %2548 = vtanh.f32 %v2087_v39 }
0x1b8f   :  { %v2549_v41 = vpop.eup %2548 }
0x1b90   :  { %v2089_v46 = vsub.f32 %v1860_v15, %v2549_v41 }
0x1b92   :  { %2091 = vrot.lane.b32.xlu0 %v2089_v46, %s2673_s0 }
0x1b96   :  { %2106 = vrot.lane.b32.xlu0 %v2168_v63, %s2665_s27 }
0x1c04   :  { %v2092_v42 = vpop.permute.xlu0 %2091 }
0x1c05   :  { %v2094_v43 = vmul.f32 %v2092_v42, %v2076_v3 }
0x1c07   :  { %2096 = vrot.lane.b32.xlu1 %v2094_v43, %s2674_s14 }
0x1c08   :  { %v2107_v24 = vpop.permute.xlu0 %2106 }
0x1c79   :  { %v2097_v44 = vpop.permute.xlu1 %2096 }
0x1c7a   :  { %v2099_v20 = vadd.f32 %v2549_v41, %v2097_v44 }
0x1c7c   :  { %v2109_v14 = vmul.f32 %v2107_v24, %v2099_v20 }
0x1c7e   :  { %2111 = vrot.lane.b32.xlu1 %v2109_v14, %s2665_s27 }
0x1cf0   :  { %v2112_v27 = vpop.permute.xlu1 %2111 }
0x1cf1   :  { %v2115_v16 = vsel %vm2114_vm3, %v2112_v27, 0.0 }
0x1cf2   :  { %2116 = vadd.xlane.f32.xlu0 %v2115_v16 }
0x1d7b   :  { %v2117_v51 = vpop.xlane.xlu0 %2116 }
0x1d7c   :  { %v2125_v54 = vadd.f32 %v2169_v34, %v2117_v51 }
0x1d7e   :  { %2127 = vst.msk [vmem:[%s3290_s11] sm:$0x3] %vm2126_vm4, %v2125_v54 }
0x1d7f   :  { %2132 = vsyncpa [#allocation4], 1 }
0x1d80   :  { %2133 = vsyncpa [#allocation6], 1 }
0x1d81   :  { %2134 = vsyncpa [#allocation9], 1 }

</bundles_post_ra>
